<compile_context>
chip_gen: v5e
topology: v5e:2x2
jax: 0.10.0
libtpu: 0.0.40
codegen_flags: <defaults>
</compile_context>

<pallas_src>
import functools
import math

import jax
import jax.numpy as jnp
from jax import lax
from jax.experimental import pallas as pl
from jax.experimental.pallas import tpu as pltpu

# MXU input dtype (accumulation is always f32).  Set to jnp.float32 for exact f32 matmuls.
MATMUL_DTYPE = jnp.bfloat16
LN_EPS = 1e-5
BN_EPS = 1e-5


# ----------------------------- in-kernel helpers -----------------------------

def _layernorm(x, g, b, eps=LN_EPS):
    mu = jnp.mean(x, axis=-1, keepdims=True)
    var = jnp.mean((x - mu) * (x - mu), axis=-1, keepdims=True)
    return (x - mu) * lax.rsqrt(var + eps) * g + b


def _sigmoid(x):
    return 1.0 / (1.0 + jnp.exp(-x))


# ------------------------------ fused layer kernel ----------------------------

def conformer_layer_kernel(
    # activation block for one batch element: (L, D)
    x_ref,
    # ffn1
    f1g_ref, f1b_ref, f1w1_ref, f1b1_ref, f1w2_ref, f1b2_ref,
    # mha (pre-norm params + fused projections)
    mg_ref, mb_ref, wqkv_ref, bqkv_ref, wo_ref, bo_ref,
    # conv module
    cg_ref, cb_ref, pw1_ref, dw_ref, bns_ref, bnh_ref, pw2_ref,
    # ffn2
    f2g_ref, f2b_ref, f2w1_ref, f2b1_ref, f2w2_ref, f2b2_ref,
    # final layernorm
    lg_ref, lb_ref,
    # output
    out_ref,
    # VMEM scratch: concatenated attention head outputs, (L, D) f32
    heads_ref,
    *, n_heads, inner, kernel_size, compute_dtype,
):
    L, D = x_ref.shape
    Dh = D // n_heads
    pad = kernel_size // 2
    scale = 1.0 / math.sqrt(Dh)
    cd = compute_dtype

    def mm(a, w):
        # MXU dot with f32 accumulation (weights already stored in compute_dtype).
        return jnp.dot(a, w, preferred_element_type=jnp.float32)

    def ffn(xin, g_ref, b_ref, w1_ref, b1_ref, w2_ref, b2_ref):
        # x + 0.5 * (Linear(ReLU(Linear(LN(x)))))
        h = _layernorm(xin, g_ref[...], b_ref[...])
        h = jnp.maximum(mm(h.astype(cd), w1_ref[...]) + b1_ref[...], 0.0)
        h = mm(h.astype(cd), w2_ref[...]) + b2_ref[...]
        return xin + 0.5 * h

    x = x_ref[...].astype(jnp.float32)                                   # (L, D)

    # ---------------- feed-forward module 1 ----------------
    x = ffn(x, f1g_ref, f1b_ref, f1w1_ref, f1b1_ref, f1w2_ref, f1b2_ref)

    # ---------------- MHA module:  x = LN(x);  x = x + MHA(x, x, x) ----------------
    xn = _layernorm(x, mg_ref[...], mb_ref[...])
    # one fused (L,D)x(D,3D) projection instead of 3*H per-head Dh-wide dots
    qkv = mm(xn.astype(cd), wqkv_ref[...]) + bqkv_ref[...]               # (L, 3D) f32
    # hoist activation->bf16 casts out of the head loop (cast each of q/k/v exactly once)
    q = (qkv[:, 0:D] * scale).astype(cd)
    k = qkv[:, D:2 * D].astype(cd)
    v = qkv[:, 2 * D:3 * D].astype(cd)
    for h in range(n_heads):                       # static unroll over heads
        sl = slice(h * Dh, (h + 1) * Dh)
        s = lax.dot_general(q[:, sl], k[:, sl],
                            dimension_numbers=(((1,), (1,)), ((), ())),
                            preferred_element_type=jnp.float32)          # (L, L)
        m = jnp.max(s, axis=-1, keepdims=True)
        e = jnp.exp(s - m)
        p = e * pl.reciprocal(jnp.sum(e, axis=-1, keepdims=True), approx=True)
        heads_ref[:, sl] = mm(p.astype(cd), v[:, sl])                    # (L, Dh) -> scratch
    # single (L,D)x(D,D) output projection on the concatenated heads (no per-head dots)
    x = xn + mm(heads_ref[...].astype(cd), wo_ref[...]) + bo_ref[...]

    # ---------------- convolution module:  x = x + Conv(x) ----------------
    hc = _layernorm(x, cg_ref[...], cb_ref[...])
    glu_in = mm(hc.astype(cd), pw1_ref[...])                             # (L, 2*inner), merged 1x1 conv
    y = glu_in[:, 0:inner] * _sigmoid(glu_in[:, inner:2 * inner])        # GLU (value * sigmoid(gate))

    # depthwise conv along L (padding = K//2, groups = inner, no bias) via XLU sublane rotations
    # + broadcast edge masks — no padded scratch, no unaligned sliding-window relayout copies.
    row = lax.broadcasted_iota(jnp.int32, (L, 1), 0)
    acc = jnp.zeros((L, inner), jnp.float32)
    for j in range(kernel_size):                    # static unroll over taps
        off = j - pad                               # out[i] += w[j] * y[i + off]
        tap = dw_ref[j:j + 1, :]                    # (1, inner)
        if off == 0:
            acc = acc + y * tap
            continue
        if abs(off) >= L:
            continue                                # tap reads entirely outside [0, L) -> zero
        shifted = pltpu.roll(y, (-off) % L, 0)      # shifted[i] = y[(i + off) % L]   (jnp.roll sem.)
        valid = jnp.logical_and(row + off >= 0, row + off < L)
        acc = acc + jnp.where(valid, shifted, 0.0) * tap

    # BatchNorm1d (eval mode; running stats folded host-side into scale/shift), then SiLU
    z = acc * bns_ref[...] + bnh_ref[...]
    z = z * _sigmoid(z)
    x = x + mm(z.astype(cd), pw2_ref[...])

    # ---------------- feed-forward module 2 + final LayerNorm (fused) ----------------
    x = ffn(x, f2g_ref, f2b_ref, f2w1_ref, f2b1_ref, f2w2_ref, f2b2_ref)
    out_ref[...] = _layernorm(x, lg_ref[...], lb_ref[...]).astype(out_ref.dtype)


# ------------------------------- pallas wrapper --------------------------------

def _const_index_map(ndim):
    zeros = (0,) * ndim
    return lambda b: zeros


def _vmem_limit_bytes():
    """3/4 of physical VMEM: ~96 MiB on v5e/v6e (128 MiB), ~48 MiB on v7x (64 MiB)."""
    cap = 64 * 1024 * 1024
    try:
        info_fn = getattr(pltpu, "get_tpu_info", None)
        if info_fn is not None:
            cap = int(getattr(info_fn(), "vmem_capacity_bytes", cap))
    except Exception:
        pass
    return max(32 * 1024 * 1024, (3 * cap) // 4)


def conformer_layer_call(x_bld, p, n_heads):
    """x_bld: (B, L, D).  One fused pallas_call for the whole ConformerLayer."""
    B, L, D = x_bld.shape
    kernel_size, inner = p["conv"]["dw"].shape

    # Fold BatchNorm1d running statistics (eval mode) into a single scale/shift pair.
    bn_scale = p["conv"]["bn_g"] * lax.rsqrt(p["conv"]["bn_var"] + BN_EPS)
    bn_shift = p["conv"]["bn_b"] - p["conv"]["bn_mean"] * bn_scale

    weights = [
        # ffn1
        p["ffn1"]["ln_g"], p["ffn1"]["ln_b"], p["ffn1"]["w1"], p["ffn1"]["b1"],
        p["ffn1"]["w2"], p["ffn1"]["b2"],
        # mha (fused QKV + fused output projection)
        p["mha"]["ln_g"], p["mha"]["ln_b"], p["mha"]["wqkv"], p["mha"]["bqkv"],
        p["mha"]["wo"], p["mha"]["bo"],
        # conv module (merged GLU 1x1 conv)
        p["conv"]["ln_g"], p["conv"]["ln_b"], p["conv"]["pw1"], p["conv"]["dw"],
        bn_scale, bn_shift, p["conv"]["pw2"],
        # ffn2
        p["ffn2"]["ln_g"], p["ffn2"]["ln_b"], p["ffn2"]["w1"], p["ffn2"]["b1"],
        p["ffn2"]["w2"], p["ffn2"]["b2"],
        # final layernorm
        p["ln_final"]["g"], p["ln_final"]["b"],
    ]

    x_spec = pl.BlockSpec((None, L, D), lambda b: (b, 0, 0))
    # Constant index_maps -> the pipeline re-fetches nothing after the first grid step and the
    # weights stay VMEM-resident.
    # TODO(synk): single-buffer these specs (pipeline_mode=pl.Buffered(1)) on v7x to halve the
    #             resident weight footprint; add flash-style L tiling for L>=1k, D>=512.
    w_specs = [pl.BlockSpec(tuple(w.shape), _const_index_map(w.ndim)) for w in weights]
    out_spec = pl.BlockSpec((None, L, D), lambda b: (b, 0, 0))

    kernel = functools.partial(
        conformer_layer_kernel,
        n_heads=n_heads, inner=inner, kernel_size=kernel_size, compute_dtype=MATMUL_DTYPE)

    return pl.pallas_call(
        kernel,
        out_shape=jax.ShapeDtypeStruct((B, L, D), x_bld.dtype),
        grid_spec=pltpu.PrefetchScalarGridSpec(
            num_scalar_prefetch=0,
            grid=(B,),
            in_specs=[x_spec] + w_specs,
            out_specs=out_spec,
            scratch_shapes=[pltpu.VMEM((L, D), jnp.float32)],   # concatenated head outputs
        ),
        compiler_params=pltpu.CompilerParams(
            dimension_semantics=("parallel",),      # shard batch across TensorCores (v7x)
            vmem_limit_bytes=_vmem_limit_bytes(),
        ),
        input_output_aliases={0: 0},                # write the layer output in place
    )(x_bld, *weights)


# ------------------------------- model plumbing --------------------------------

def init_layer_params(key, d_model, n_heads, expansion_factor=2, ff_mult=4, conv_kernel=15):
    assert d_model % n_heads == 0
    inner = d_model * expansion_factor
    hidden = d_model * ff_mult
    ks = jax.random.split(key, 8)
    wdt = MATMUL_DTYPE

    def w(k, shape, scale=0.05, dtype=wdt):
        return (scale * jax.random.normal(k, shape)).astype(dtype)

    def ffn_p(k):
        k1, k2 = jax.random.split(k)
        return dict(
            ln_g=jnp.ones((1, d_model), jnp.float32),
            ln_b=jnp.zeros((1, d_model), jnp.float32),
            w1=w(k1, (d_model, hidden)),            # == Linear(d, 4d).weight.T
            b1=jnp.zeros((1, hidden), jnp.float32),
            w2=w(k2, (hidden, d_model)),            # == Linear(4d, d).weight.T
            b2=jnp.zeros((1, d_model), jnp.float32),
        )

    mha = dict(
        ln_g=jnp.ones((1, d_model), jnp.float32),
        ln_b=jnp.zeros((1, d_model), jnp.float32),
        # wqkv == in_proj_weight.T, columns ordered [Q | K | V]           (D, 3D)
        wqkv=w(ks[2], (d_model, 3 * d_model)),
        bqkv=jnp.zeros((1, 3 * d_model), jnp.float32),
        # wo == out_proj.weight.T                                         (D, D)
        wo=w(ks[3], (d_model, d_model)),
        bo=jnp.zeros((1, d_model), jnp.float32),
    )

    conv = dict(
        ln_g=jnp.ones((1, d_model), jnp.float32),
        ln_b=jnp.zeros((1, d_model), jnp.float32),
        # pw1 == Conv1d(d, 2*inner, 1).weight[:, :, 0].T  (D, 2*inner), columns [value | gate]
        pw1=w(ks[4], (d_model, 2 * inner)),
        # dw[k, c] == depthwise Conv1d.weight[c, 0, k]                    (K, inner)
        dw=w(ks[5], (conv_kernel, inner), dtype=jnp.float32),
        bn_g=jnp.ones((1, inner), jnp.float32),
        bn_b=jnp.zeros((1, inner), jnp.float32),
        bn_mean=jnp.zeros((1, inner), jnp.float32),   # BatchNorm1d running stats (eval mode)
        bn_var=jnp.ones((1, inner), jnp.float32),
        pw2=w(ks[6], (inner, d_model)),             # Conv1d(inner, d, 1).weight[:, :, 0].T
    )

    return dict(
        ffn1=ffn_p(ks[0]),
        mha=mha,
        conv=conv,
        ffn2=ffn_p(ks[1]),
        ln_final=dict(g=jnp.ones((1, d_model), jnp.float32),
                      b=jnp.zeros((1, d_model), jnp.float32)),
    )


def conformer_forward(x_lbd, layer_params, n_heads):
    """x_lbd: (L, B, D), seq-first like the PyTorch module (batch_first=False)."""
    x = jnp.transpose(x_lbd, (1, 0, 2))             # (B, L, D) -- single relayout for the model
    for p in layer_params:
        x = conformer_layer_call(x, p, n_heads)
    return jnp.transpose(x, (1, 0, 2))              # back to (L, B, D)


# ----------------------------------- main ---------------------------------------

if __name__ == "__main__":
    # Small smoke-test shapes; production configs should use D/Dh/inner/hidden that are multiples
    # of 128 and L a multiple of 8 so all loads/stores are lane/sublane dense.
    L, B, D = 8, 2, 32          # seq_len, batch, d_model
    n_heads = 4
    num_layer = 2
    conv_kernel = 15
    expansion_factor = 2
    ff_mult = 4

    key = jax.random.PRNGKey(0)
    key, xk = jax.random.split(key)
    x = jax.random.normal(xk, (L, B, D), dtype=jnp.float32)

    layer_params = []
    for _ in range(num_layer):
        key, sub = jax.random.split(key)
        layer_params.append(
            init_layer_params(sub, D, n_heads,
                              expansion_factor=expansion_factor,
                              ff_mult=ff_mult,
                              conv_kernel=conv_kernel))

    fwd = jax.jit(conformer_forward, static_argnums=2)
    out = jax.block_until_ready(fwd(x, layer_params, n_heads))

    assert out.shape == (L, B, D) and out.dtype == jnp.float32
    assert bool(jnp.all(jnp.isfinite(out)))
    print("KERNEL_OK")
</pallas_src>

<mosaic_0001>
module attributes {stable_mosaic.version = 11 : i64} {
  func.func @conformer_layer_kernel(%arg0: i32, %arg1: memref<1x8x32xf32, #tpu.memory_space<vmem>>, %arg2: memref<1x32xf32, #tpu.memory_space<vmem>>, %arg3: memref<1x32xf32, #tpu.memory_space<vmem>>, %arg4: memref<32x128xbf16, #tpu.memory_space<vmem>>, %arg5: memref<1x128xf32, #tpu.memory_space<vmem>>, %arg6: memref<128x32xbf16, #tpu.memory_space<vmem>>, %arg7: memref<1x32xf32, #tpu.memory_space<vmem>>, %arg8: memref<1x32xf32, #tpu.memory_space<vmem>>, %arg9: memref<1x32xf32, #tpu.memory_space<vmem>>, %arg10: memref<32x96xbf16, #tpu.memory_space<vmem>>, %arg11: memref<1x96xf32, #tpu.memory_space<vmem>>, %arg12: memref<32x32xbf16, #tpu.memory_space<vmem>>, %arg13: memref<1x32xf32, #tpu.memory_space<vmem>>, %arg14: memref<1x32xf32, #tpu.memory_space<vmem>>, %arg15: memref<1x32xf32, #tpu.memory_space<vmem>>, %arg16: memref<32x128xbf16, #tpu.memory_space<vmem>>, %arg17: memref<15x64xf32, #tpu.memory_space<vmem>>, %arg18: memref<1x64xf32, #tpu.memory_space<vmem>>, %arg19: memref<1x64xf32, #tpu.memory_space<vmem>>, %arg20: memref<64x32xbf16, #tpu.memory_space<vmem>>, %arg21: memref<1x32xf32, #tpu.memory_space<vmem>>, %arg22: memref<1x32xf32, #tpu.memory_space<vmem>>, %arg23: memref<32x128xbf16, #tpu.memory_space<vmem>>, %arg24: memref<1x128xf32, #tpu.memory_space<vmem>>, %arg25: memref<128x32xbf16, #tpu.memory_space<vmem>>, %arg26: memref<1x32xf32, #tpu.memory_space<vmem>>, %arg27: memref<1x32xf32, #tpu.memory_space<vmem>>, %arg28: memref<1x32xf32, #tpu.memory_space<vmem>>, %arg29: memref<1x8x32xf32, #tpu.memory_space<vmem>>, %arg30: memref<8x32xf32, #tpu.memory_space<vmem>>) attributes {dimension_semantics = [#tpu.dimension_semantics<parallel>], iteration_bounds = array<i64: 2>, scalar_prefetch = 0 : i64, scratch_operands = 1 : i64, tpu.core_type = #tpu.core_type<tc>, window_params = [{transform_indices = @transform_0, window_bounds = array<i64: 1, 8, 32>}, {pipeline_mode = #tpu.pipeline_mode<synchronous>, transform_indices = @transform_1, window_bounds = array<i64: 1, 32>}, {pipeline_mode = #tpu.pipeline_mode<synchronous>, transform_indices = @transform_2, window_bounds = array<i64: 1, 32>}, {pipeline_mode = #tpu.pipeline_mode<synchronous>, transform_indices = @transform_3, window_bounds = array<i64: 32, 128>}, {pipeline_mode = #tpu.pipeline_mode<synchronous>, transform_indices = @transform_4, window_bounds = array<i64: 1, 128>}, {pipeline_mode = #tpu.pipeline_mode<synchronous>, transform_indices = @transform_5, window_bounds = array<i64: 128, 32>}, {pipeline_mode = #tpu.pipeline_mode<synchronous>, transform_indices = @transform_6, window_bounds = array<i64: 1, 32>}, {pipeline_mode = #tpu.pipeline_mode<synchronous>, transform_indices = @transform_7, window_bounds = array<i64: 1, 32>}, {pipeline_mode = #tpu.pipeline_mode<synchronous>, transform_indices = @transform_8, window_bounds = array<i64: 1, 32>}, {pipeline_mode = #tpu.pipeline_mode<synchronous>, transform_indices = @transform_9, window_bounds = array<i64: 32, 96>}, {pipeline_mode = #tpu.pipeline_mode<synchronous>, transform_indices = @transform_10, window_bounds = array<i64: 1, 96>}, {pipeline_mode = #tpu.pipeline_mode<synchronous>, transform_indices = @transform_11, window_bounds = array<i64: 32, 32>}, {pipeline_mode = #tpu.pipeline_mode<synchronous>, transform_indices = @transform_12, window_bounds = array<i64: 1, 32>}, {pipeline_mode = #tpu.pipeline_mode<synchronous>, transform_indices = @transform_13, window_bounds = array<i64: 1, 32>}, {pipeline_mode = #tpu.pipeline_mode<synchronous>, transform_indices = @transform_14, window_bounds = array<i64: 1, 32>}, {pipeline_mode = #tpu.pipeline_mode<synchronous>, transform_indices = @transform_15, window_bounds = array<i64: 32, 128>}, {pipeline_mode = #tpu.pipeline_mode<synchronous>, transform_indices = @transform_16, window_bounds = array<i64: 15, 64>}, {pipeline_mode = #tpu.pipeline_mode<synchronous>, transform_indices = @transform_17, window_bounds = array<i64: 1, 64>}, {pipeline_mode = #tpu.pipeline_mode<synchronous>, transform_indices = @transform_18, window_bounds = array<i64: 1, 64>}, {pipeline_mode = #tpu.pipeline_mode<synchronous>, transform_indices = @transform_19, window_bounds = array<i64: 64, 32>}, {pipeline_mode = #tpu.pipeline_mode<synchronous>, transform_indices = @transform_20, window_bounds = array<i64: 1, 32>}, {pipeline_mode = #tpu.pipeline_mode<synchronous>, transform_indices = @transform_21, window_bounds = array<i64: 1, 32>}, {pipeline_mode = #tpu.pipeline_mode<synchronous>, transform_indices = @transform_22, window_bounds = array<i64: 32, 128>}, {pipeline_mode = #tpu.pipeline_mode<synchronous>, transform_indices = @transform_23, window_bounds = array<i64: 1, 128>}, {pipeline_mode = #tpu.pipeline_mode<synchronous>, transform_indices = @transform_24, window_bounds = array<i64: 128, 32>}, {pipeline_mode = #tpu.pipeline_mode<synchronous>, transform_indices = @transform_25, window_bounds = array<i64: 1, 32>}, {pipeline_mode = #tpu.pipeline_mode<synchronous>, transform_indices = @transform_26, window_bounds = array<i64: 1, 32>}, {pipeline_mode = #tpu.pipeline_mode<synchronous>, transform_indices = @transform_27, window_bounds = array<i64: 1, 32>}, {transform_indices = @transform_28, window_bounds = array<i64: 1, 8, 32>}]} {
    %c0 = arith.constant 0 : index
    %c0_0 = arith.constant 0 : index
    %c0_1 = arith.constant 0 : index
    %0 = vector.load %arg1[%c0, %c0_0, %c0_1] : memref<1x8x32xf32, #tpu.memory_space<vmem>>, vector<1x8x32xf32>
    %1 = vector.shape_cast %0 : vector<1x8x32xf32> to vector<8x32xf32>
    %c0_2 = arith.constant 0 : index
    %c0_3 = arith.constant 0 : index
    %2 = vector.load %arg2[%c0_2, %c0_3] : memref<1x32xf32, #tpu.memory_space<vmem>>, vector<1x32xf32>
    %c0_4 = arith.constant 0 : index
    %c0_5 = arith.constant 0 : index
    %3 = vector.load %arg3[%c0_4, %c0_5] : memref<1x32xf32, #tpu.memory_space<vmem>>, vector<1x32xf32>
    %cst = arith.constant dense<0.000000e+00> : vector<8xf32>
    %4 = vector.multi_reduction <add>, %1, %cst [1] : vector<8x32xf32> to vector<8xf32>
    %5 = vector.shape_cast %4 : vector<8xf32> to vector<8x1xf32>
    %cst_6 = arith.constant 3.200000e+01 : f32
    %6 = vector.broadcast %cst_6 : f32 to vector<8x1xf32>
    %7 = arith.divf %5, %6 : vector<8x1xf32>
    %8 = vector.broadcast %7 : vector<8x1xf32> to vector<8x32xf32>
    %9 = arith.subf %1, %8 : vector<8x32xf32>
    %10 = vector.broadcast %7 : vector<8x1xf32> to vector<8x32xf32>
    %11 = arith.subf %1, %10 : vector<8x32xf32>
    %12 = arith.mulf %9, %11 : vector<8x32xf32>
    %cst_7 = arith.constant dense<0.000000e+00> : vector<8xf32>
    %13 = vector.multi_reduction <add>, %12, %cst_7 [1] : vector<8x32xf32> to vector<8xf32>
    %14 = vector.shape_cast %13 : vector<8xf32> to vector<8x1xf32>
    %cst_8 = arith.constant 3.200000e+01 : f32
    %15 = vector.broadcast %cst_8 : f32 to vector<8x1xf32>
    %16 = arith.divf %14, %15 : vector<8x1xf32>
    %17 = vector.broadcast %7 : vector<8x1xf32> to vector<8x32xf32>
    %18 = arith.subf %1, %17 : vector<8x32xf32>
    %cst_9 = arith.constant 9.99999974E-6 : f32
    %19 = vector.broadcast %cst_9 : f32 to vector<8x1xf32>
    %20 = arith.addf %16, %19 : vector<8x1xf32>
    %21 = math.rsqrt %20 : vector<8x1xf32>
    %22 = vector.broadcast %21 : vector<8x1xf32> to vector<8x32xf32>
    %23 = arith.mulf %18, %22 : vector<8x32xf32>
    %24 = vector.broadcast %2 : vector<1x32xf32> to vector<8x32xf32>
    %25 = arith.mulf %23, %24 : vector<8x32xf32>
    %26 = vector.broadcast %3 : vector<1x32xf32> to vector<8x32xf32>
    %27 = arith.addf %25, %26 : vector<8x32xf32>
    %28 = arith.truncf %27 : vector<8x32xf32> to vector<8x32xbf16>
    %c0_10 = arith.constant 0 : index
    %c0_11 = arith.constant 0 : index
    %29 = vector.load %arg4[%c0_10, %c0_11] : memref<32x128xbf16, #tpu.memory_space<vmem>>, vector<32x128xbf16>
    %cst_12 = arith.constant dense<0.000000e+00> : vector<8x128xf32>
    %30 = tpu.matmul %28, %29, %cst_12 {dimension_numbers = #tpu.dot_dimension_numbers<[1], [0], [0], [1], [0, 0, 1, 1], [], []>} : vector<8x32xbf16>, vector<32x128xbf16>, vector<8x128xf32> -> vector<8x128xf32>
    %c0_13 = arith.constant 0 : index
    %c0_14 = arith.constant 0 : index
    %31 = vector.load %arg5[%c0_13, %c0_14] : memref<1x128xf32, #tpu.memory_space<vmem>>, vector<1x128xf32>
    %32 = vector.broadcast %31 : vector<1x128xf32> to vector<8x128xf32>
    %33 = arith.addf %30, %32 : vector<8x128xf32>
    %cst_15 = arith.constant 0.000000e+00 : f32
    %34 = vector.broadcast %cst_15 : f32 to vector<8x128xf32>
    %35 = arith.maximumf %33, %34 : vector<8x128xf32>
    %36 = arith.truncf %35 : vector<8x128xf32> to vector<8x128xbf16>
    %c0_16 = arith.constant 0 : index
    %c0_17 = arith.constant 0 : index
    %37 = vector.load %arg6[%c0_16, %c0_17] : memref<128x32xbf16, #tpu.memory_space<vmem>>, vector<128x32xbf16>
    %cst_18 = arith.constant dense<0.000000e+00> : vector<8x32xf32>
    %38 = tpu.matmul %36, %37, %cst_18 {dimension_numbers = #tpu.dot_dimension_numbers<[1], [0], [0], [1], [0, 0, 1, 1], [], []>} : vector<8x128xbf16>, vector<128x32xbf16>, vector<8x32xf32> -> vector<8x32xf32>
    %c0_19 = arith.constant 0 : index
    %c0_20 = arith.constant 0 : index
    %39 = vector.load %arg7[%c0_19, %c0_20] : memref<1x32xf32, #tpu.memory_space<vmem>>, vector<1x32xf32>
    %40 = vector.broadcast %39 : vector<1x32xf32> to vector<8x32xf32>
    %41 = arith.addf %38, %40 : vector<8x32xf32>
    %cst_21 = arith.constant 5.000000e-01 : f32
    %42 = vector.broadcast %cst_21 : f32 to vector<8x32xf32>
    %43 = arith.mulf %42, %41 : vector<8x32xf32>
    %44 = arith.addf %1, %43 : vector<8x32xf32>
    %c0_22 = arith.constant 0 : index
    %c0_23 = arith.constant 0 : index
    %45 = vector.load %arg8[%c0_22, %c0_23] : memref<1x32xf32, #tpu.memory_space<vmem>>, vector<1x32xf32>
    %c0_24 = arith.constant 0 : index
    %c0_25 = arith.constant 0 : index
    %46 = vector.load %arg9[%c0_24, %c0_25] : memref<1x32xf32, #tpu.memory_space<vmem>>, vector<1x32xf32>
    %cst_26 = arith.constant dense<0.000000e+00> : vector<8xf32>
    %47 = vector.multi_reduction <add>, %44, %cst_26 [1] : vector<8x32xf32> to vector<8xf32>
    %48 = vector.shape_cast %47 : vector<8xf32> to vector<8x1xf32>
    %cst_27 = arith.constant 3.200000e+01 : f32
    %49 = vector.broadcast %cst_27 : f32 to vector<8x1xf32>
    %50 = arith.divf %48, %49 : vector<8x1xf32>
    %51 = vector.broadcast %50 : vector<8x1xf32> to vector<8x32xf32>
    %52 = arith.subf %44, %51 : vector<8x32xf32>
    %53 = vector.broadcast %50 : vector<8x1xf32> to vector<8x32xf32>
    %54 = arith.subf %44, %53 : vector<8x32xf32>
    %55 = arith.mulf %52, %54 : vector<8x32xf32>
    %cst_28 = arith.constant dense<0.000000e+00> : vector<8xf32>
    %56 = vector.multi_reduction <add>, %55, %cst_28 [1] : vector<8x32xf32> to vector<8xf32>
    %57 = vector.shape_cast %56 : vector<8xf32> to vector<8x1xf32>
    %cst_29 = arith.constant 3.200000e+01 : f32
    %58 = vector.broadcast %cst_29 : f32 to vector<8x1xf32>
    %59 = arith.divf %57, %58 : vector<8x1xf32>
    %60 = vector.broadcast %50 : vector<8x1xf32> to vector<8x32xf32>
    %61 = arith.subf %44, %60 : vector<8x32xf32>
    %cst_30 = arith.constant 9.99999974E-6 : f32
    %62 = vector.broadcast %cst_30 : f32 to vector<8x1xf32>
    %63 = arith.addf %59, %62 : vector<8x1xf32>
    %64 = math.rsqrt %63 : vector<8x1xf32>
    %65 = vector.broadcast %64 : vector<8x1xf32> to vector<8x32xf32>
    %66 = arith.mulf %61, %65 : vector<8x32xf32>
    %67 = vector.broadcast %45 : vector<1x32xf32> to vector<8x32xf32>
    %68 = arith.mulf %66, %67 : vector<8x32xf32>
    %69 = vector.broadcast %46 : vector<1x32xf32> to vector<8x32xf32>
    %70 = arith.addf %68, %69 : vector<8x32xf32>
    %71 = arith.truncf %70 : vector<8x32xf32> to vector<8x32xbf16>
    %c0_31 = arith.constant 0 : index
    %c0_32 = arith.constant 0 : index
    %72 = vector.load %arg10[%c0_31, %c0_32] : memref<32x96xbf16, #tpu.memory_space<vmem>>, vector<32x96xbf16>
    %cst_33 = arith.constant dense<0.000000e+00> : vector<8x96xf32>
    %73 = tpu.matmul %71, %72, %cst_33 {dimension_numbers = #tpu.dot_dimension_numbers<[1], [0], [0], [1], [0, 0, 1, 1], [], []>} : vector<8x32xbf16>, vector<32x96xbf16>, vector<8x96xf32> -> vector<8x96xf32>
    %c0_34 = arith.constant 0 : index
    %c0_35 = arith.constant 0 : index
    %74 = vector.load %arg11[%c0_34, %c0_35] : memref<1x96xf32, #tpu.memory_space<vmem>>, vector<1x96xf32>
    %75 = vector.broadcast %74 : vector<1x96xf32> to vector<8x96xf32>
    %76 = arith.addf %73, %75 : vector<8x96xf32>
    %77 = vector.extract_strided_slice %76 {offsets = [0, 0], sizes = [8, 32], strides = [1, 1]} : vector<8x96xf32> to vector<8x32xf32>
    %cst_36 = arith.constant 0.353553385 : f32
    %78 = vector.broadcast %cst_36 : f32 to vector<8x32xf32>
    %79 = arith.mulf %77, %78 : vector<8x32xf32>
    %80 = arith.truncf %79 : vector<8x32xf32> to vector<8x32xbf16>
    %81 = vector.extract_strided_slice %76 {offsets = [0, 32], sizes = [8, 32], strides = [1, 1]} : vector<8x96xf32> to vector<8x32xf32>
    %82 = arith.truncf %81 : vector<8x32xf32> to vector<8x32xbf16>
    %83 = vector.extract_strided_slice %76 {offsets = [0, 64], sizes = [8, 32], strides = [1, 1]} : vector<8x96xf32> to vector<8x32xf32>
    %84 = arith.truncf %83 : vector<8x32xf32> to vector<8x32xbf16>
    %85 = vector.extract_strided_slice %80 {offsets = [0, 0], sizes = [8, 8], strides = [1, 1]} : vector<8x32xbf16> to vector<8x8xbf16>
    %86 = vector.extract_strided_slice %82 {offsets = [0, 0], sizes = [8, 8], strides = [1, 1]} : vector<8x32xbf16> to vector<8x8xbf16>
    %cst_37 = arith.constant dense<0.000000e+00> : vector<8x8xf32>
    %87 = tpu.matmul %85, %86, %cst_37 {dimension_numbers = #tpu.dot_dimension_numbers<[1], [1], [0], [0], [0, 0, 1, 0], [], []>} : vector<8x8xbf16>, vector<8x8xbf16>, vector<8x8xf32> -> vector<8x8xf32>
    %cst_38 = arith.constant dense<0xFF800000> : vector<8xf32>
    %88 = vector.multi_reduction <maximumf>, %87, %cst_38 [1] : vector<8x8xf32> to vector<8xf32>
    %89 = vector.shape_cast %88 : vector<8xf32> to vector<8x1xf32>
    %90 = vector.broadcast %89 : vector<8x1xf32> to vector<8x8xf32>
    %91 = arith.subf %87, %90 : vector<8x8xf32>
    %92 = math.exp %91 : vector<8x8xf32>
    %cst_39 = arith.constant dense<0.000000e+00> : vector<8xf32>
    %93 = vector.multi_reduction <add>, %92, %cst_39 [1] : vector<8x8xf32> to vector<8xf32>
    %94 = vector.shape_cast %93 : vector<8xf32> to vector<8x1xf32>
    %95 = tpu.reciprocal %94 {approx = true} : vector<8x1xf32> -> vector<8x1xf32>
    %96 = vector.broadcast %95 : vector<8x1xf32> to vector<8x8xf32>
    %97 = arith.mulf %92, %96 : vector<8x8xf32>
    %98 = arith.truncf %97 : vector<8x8xf32> to vector<8x8xbf16>
    %99 = vector.extract_strided_slice %84 {offsets = [0, 0], sizes = [8, 8], strides = [1, 1]} : vector<8x32xbf16> to vector<8x8xbf16>
    %cst_40 = arith.constant dense<0.000000e+00> : vector<8x8xf32>
    %100 = tpu.matmul %98, %99, %cst_40 {dimension_numbers = #tpu.dot_dimension_numbers<[1], [0], [0], [1], [0, 0, 1, 1], [], []>} : vector<8x8xbf16>, vector<8x8xbf16>, vector<8x8xf32> -> vector<8x8xf32>
    %c0_41 = arith.constant 0 : index
    %c0_42 = arith.constant 0 : index
    %101 = vector.load %arg30[%c0_41, %c0_42] : memref<8x32xf32, #tpu.memory_space<vmem>>, vector<8x8xf32>
    tpu.vector_store %arg30[%c0_41, %c0_42], %100 {strides = array<i32>} : memref<8x32xf32, #tpu.memory_space<vmem>>, vector<8x8xf32>,
    %102 = vector.extract_strided_slice %80 {offsets = [0, 8], sizes = [8, 8], strides = [1, 1]} : vector<8x32xbf16> to vector<8x8xbf16>
    %103 = vector.extract_strided_slice %82 {offsets = [0, 8], sizes = [8, 8], strides = [1, 1]} : vector<8x32xbf16> to vector<8x8xbf16>
    %cst_43 = arith.constant dense<0.000000e+00> : vector<8x8xf32>
    %104 = tpu.matmul %102, %103, %cst_43 {dimension_numbers = #tpu.dot_dimension_numbers<[1], [1], [0], [0], [0, 0, 1, 0], [], []>} : vector<8x8xbf16>, vector<8x8xbf16>, vector<8x8xf32> -> vector<8x8xf32>
    %cst_44 = arith.constant dense<0xFF800000> : vector<8xf32>
    %105 = vector.multi_reduction <maximumf>, %104, %cst_44 [1] : vector<8x8xf32> to vector<8xf32>
    %106 = vector.shape_cast %105 : vector<8xf32> to vector<8x1xf32>
    %107 = vector.broadcast %106 : vector<8x1xf32> to vector<8x8xf32>
    %108 = arith.subf %104, %107 : vector<8x8xf32>
    %109 = math.exp %108 : vector<8x8xf32>
    %cst_45 = arith.constant dense<0.000000e+00> : vector<8xf32>
    %110 = vector.multi_reduction <add>, %109, %cst_45 [1] : vector<8x8xf32> to vector<8xf32>
    %111 = vector.shape_cast %110 : vector<8xf32> to vector<8x1xf32>
    %112 = tpu.reciprocal %111 {approx = true} : vector<8x1xf32> -> vector<8x1xf32>
    %113 = vector.broadcast %112 : vector<8x1xf32> to vector<8x8xf32>
    %114 = arith.mulf %109, %113 : vector<8x8xf32>
    %115 = arith.truncf %114 : vector<8x8xf32> to vector<8x8xbf16>
    %116 = vector.extract_strided_slice %84 {offsets = [0, 8], sizes = [8, 8], strides = [1, 1]} : vector<8x32xbf16> to vector<8x8xbf16>
    %cst_46 = arith.constant dense<0.000000e+00> : vector<8x8xf32>
    %117 = tpu.matmul %115, %116, %cst_46 {dimension_numbers = #tpu.dot_dimension_numbers<[1], [0], [0], [1], [0, 0, 1, 1], [], []>} : vector<8x8xbf16>, vector<8x8xbf16>, vector<8x8xf32> -> vector<8x8xf32>
    %c0_47 = arith.constant 0 : index
    %c8 = arith.constant 8 : index
    %118 = vector.load %arg30[%c0_47, %c8] : memref<8x32xf32, #tpu.memory_space<vmem>>, vector<8x8xf32>
    tpu.vector_store %arg30[%c0_47, %c8], %117 {strides = array<i32>} : memref<8x32xf32, #tpu.memory_space<vmem>>, vector<8x8xf32>,
    %119 = vector.extract_strided_slice %80 {offsets = [0, 16], sizes = [8, 8], strides = [1, 1]} : vector<8x32xbf16> to vector<8x8xbf16>
    %120 = vector.extract_strided_slice %82 {offsets = [0, 16], sizes = [8, 8], strides = [1, 1]} : vector<8x32xbf16> to vector<8x8xbf16>
    %cst_48 = arith.constant dense<0.000000e+00> : vector<8x8xf32>
    %121 = tpu.matmul %119, %120, %cst_48 {dimension_numbers = #tpu.dot_dimension_numbers<[1], [1], [0], [0], [0, 0, 1, 0], [], []>} : vector<8x8xbf16>, vector<8x8xbf16>, vector<8x8xf32> -> vector<8x8xf32>
    %cst_49 = arith.constant dense<0xFF800000> : vector<8xf32>
    %122 = vector.multi_reduction <maximumf>, %121, %cst_49 [1] : vector<8x8xf32> to vector<8xf32>
    %123 = vector.shape_cast %122 : vector<8xf32> to vector<8x1xf32>
    %124 = vector.broadcast %123 : vector<8x1xf32> to vector<8x8xf32>
    %125 = arith.subf %121, %124 : vector<8x8xf32>
    %126 = math.exp %125 : vector<8x8xf32>
    %cst_50 = arith.constant dense<0.000000e+00> : vector<8xf32>
    %127 = vector.multi_reduction <add>, %126, %cst_50 [1] : vector<8x8xf32> to vector<8xf32>
    %128 = vector.shape_cast %127 : vector<8xf32> to vector<8x1xf32>
    %129 = tpu.reciprocal %128 {approx = true} : vector<8x1xf32> -> vector<8x1xf32>
    %130 = vector.broadcast %129 : vector<8x1xf32> to vector<8x8xf32>
    %131 = arith.mulf %126, %130 : vector<8x8xf32>
    %132 = arith.truncf %131 : vector<8x8xf32> to vector<8x8xbf16>
    %133 = vector.extract_strided_slice %84 {offsets = [0, 16], sizes = [8, 8], strides = [1, 1]} : vector<8x32xbf16> to vector<8x8xbf16>
    %cst_51 = arith.constant dense<0.000000e+00> : vector<8x8xf32>
    %134 = tpu.matmul %132, %133, %cst_51 {dimension_numbers = #tpu.dot_dimension_numbers<[1], [0], [0], [1], [0, 0, 1, 1], [], []>} : vector<8x8xbf16>, vector<8x8xbf16>, vector<8x8xf32> -> vector<8x8xf32>
    %c0_52 = arith.constant 0 : index
    %c16 = arith.constant 16 : index
    %135 = vector.load %arg30[%c0_52, %c16] : memref<8x32xf32, #tpu.memory_space<vmem>>, vector<8x8xf32>
    tpu.vector_store %arg30[%c0_52, %c16], %134 {strides = array<i32>} : memref<8x32xf32, #tpu.memory_space<vmem>>, vector<8x8xf32>,
    %136 = vector.extract_strided_slice %80 {offsets = [0, 24], sizes = [8, 8], strides = [1, 1]} : vector<8x32xbf16> to vector<8x8xbf16>
    %137 = vector.extract_strided_slice %82 {offsets = [0, 24], sizes = [8, 8], strides = [1, 1]} : vector<8x32xbf16> to vector<8x8xbf16>
    %cst_53 = arith.constant dense<0.000000e+00> : vector<8x8xf32>
    %138 = tpu.matmul %136, %137, %cst_53 {dimension_numbers = #tpu.dot_dimension_numbers<[1], [1], [0], [0], [0, 0, 1, 0], [], []>} : vector<8x8xbf16>, vector<8x8xbf16>, vector<8x8xf32> -> vector<8x8xf32>
    %cst_54 = arith.constant dense<0xFF800000> : vector<8xf32>
    %139 = vector.multi_reduction <maximumf>, %138, %cst_54 [1] : vector<8x8xf32> to vector<8xf32>
    %140 = vector.shape_cast %139 : vector<8xf32> to vector<8x1xf32>
    %141 = vector.broadcast %140 : vector<8x1xf32> to vector<8x8xf32>
    %142 = arith.subf %138, %141 : vector<8x8xf32>
    %143 = math.exp %142 : vector<8x8xf32>
    %cst_55 = arith.constant dense<0.000000e+00> : vector<8xf32>
    %144 = vector.multi_reduction <add>, %143, %cst_55 [1] : vector<8x8xf32> to vector<8xf32>
    %145 = vector.shape_cast %144 : vector<8xf32> to vector<8x1xf32>
    %146 = tpu.reciprocal %145 {approx = true} : vector<8x1xf32> -> vector<8x1xf32>
    %147 = vector.broadcast %146 : vector<8x1xf32> to vector<8x8xf32>
    %148 = arith.mulf %143, %147 : vector<8x8xf32>
    %149 = arith.truncf %148 : vector<8x8xf32> to vector<8x8xbf16>
    %150 = vector.extract_strided_slice %84 {offsets = [0, 24], sizes = [8, 8], strides = [1, 1]} : vector<8x32xbf16> to vector<8x8xbf16>
    %cst_56 = arith.constant dense<0.000000e+00> : vector<8x8xf32>
    %151 = tpu.matmul %149, %150, %cst_56 {dimension_numbers = #tpu.dot_dimension_numbers<[1], [0], [0], [1], [0, 0, 1, 1], [], []>} : vector<8x8xbf16>, vector<8x8xbf16>, vector<8x8xf32> -> vector<8x8xf32>
    %c0_57 = arith.constant 0 : index
    %c24 = arith.constant 24 : index
    %152 = vector.load %arg30[%c0_57, %c24] : memref<8x32xf32, #tpu.memory_space<vmem>>, vector<8x8xf32>
    tpu.vector_store %arg30[%c0_57, %c24], %151 {strides = array<i32>} : memref<8x32xf32, #tpu.memory_space<vmem>>, vector<8x8xf32>,
    %c0_58 = arith.constant 0 : index
    %c0_59 = arith.constant 0 : index
    %153 = vector.load %arg30[%c0_58, %c0_59] : memref<8x32xf32, #tpu.memory_space<vmem>>, vector<8x32xf32>
    %154 = arith.truncf %153 : vector<8x32xf32> to vector<8x32xbf16>
    %c0_60 = arith.constant 0 : index
    %c0_61 = arith.constant 0 : index
    %155 = vector.load %arg12[%c0_60, %c0_61] : memref<32x32xbf16, #tpu.memory_space<vmem>>, vector<32x32xbf16>
    %cst_62 = arith.constant dense<0.000000e+00> : vector<8x32xf32>
    %156 = tpu.matmul %154, %155, %cst_62 {dimension_numbers = #tpu.dot_dimension_numbers<[1], [0], [0], [1], [0, 0, 1, 1], [], []>} : vector<8x32xbf16>, vector<32x32xbf16>, vector<8x32xf32> -> vector<8x32xf32>
    %157 = arith.addf %70, %156 : vector<8x32xf32>
    %c0_63 = arith.constant 0 : index
    %c0_64 = arith.constant 0 : index
    %158 = vector.load %arg13[%c0_63, %c0_64] : memref<1x32xf32, #tpu.memory_space<vmem>>, vector<1x32xf32>
    %159 = vector.broadcast %158 : vector<1x32xf32> to vector<8x32xf32>
    %160 = arith.addf %157, %159 : vector<8x32xf32>
    %c0_65 = arith.constant 0 : index
    %c0_66 = arith.constant 0 : index
    %161 = vector.load %arg14[%c0_65, %c0_66] : memref<1x32xf32, #tpu.memory_space<vmem>>, vector<1x32xf32>
    %c0_67 = arith.constant 0 : index
    %c0_68 = arith.constant 0 : index
    %162 = vector.load %arg15[%c0_67, %c0_68] : memref<1x32xf32, #tpu.memory_space<vmem>>, vector<1x32xf32>
    %cst_69 = arith.constant dense<0.000000e+00> : vector<8xf32>
    %163 = vector.multi_reduction <add>, %160, %cst_69 [1] : vector<8x32xf32> to vector<8xf32>
    %164 = vector.shape_cast %163 : vector<8xf32> to vector<8x1xf32>
    %cst_70 = arith.constant 3.200000e+01 : f32
    %165 = vector.broadcast %cst_70 : f32 to vector<8x1xf32>
    %166 = arith.divf %164, %165 : vector<8x1xf32>
    %167 = vector.broadcast %166 : vector<8x1xf32> to vector<8x32xf32>
    %168 = arith.subf %160, %167 : vector<8x32xf32>
    %169 = vector.broadcast %166 : vector<8x1xf32> to vector<8x32xf32>
    %170 = arith.subf %160, %169 : vector<8x32xf32>
    %171 = arith.mulf %168, %170 : vector<8x32xf32>
    %cst_71 = arith.constant dense<0.000000e+00> : vector<8xf32>
    %172 = vector.multi_reduction <add>, %171, %cst_71 [1] : vector<8x32xf32> to vector<8xf32>
    %173 = vector.shape_cast %172 : vector<8xf32> to vector<8x1xf32>
    %cst_72 = arith.constant 3.200000e+01 : f32
    %174 = vector.broadcast %cst_72 : f32 to vector<8x1xf32>
    %175 = arith.divf %173, %174 : vector<8x1xf32>
    %176 = vector.broadcast %166 : vector<8x1xf32> to vector<8x32xf32>
    %177 = arith.subf %160, %176 : vector<8x32xf32>
    %cst_73 = arith.constant 9.99999974E-6 : f32
    %178 = vector.broadcast %cst_73 : f32 to vector<8x1xf32>
    %179 = arith.addf %175, %178 : vector<8x1xf32>
    %180 = math.rsqrt %179 : vector<8x1xf32>
    %181 = vector.broadcast %180 : vector<8x1xf32> to vector<8x32xf32>
    %182 = arith.mulf %177, %181 : vector<8x32xf32>
    %183 = vector.broadcast %161 : vector<1x32xf32> to vector<8x32xf32>
    %184 = arith.mulf %182, %183 : vector<8x32xf32>
    %185 = vector.broadcast %162 : vector<1x32xf32> to vector<8x32xf32>
    %186 = arith.addf %184, %185 : vector<8x32xf32>
    %187 = arith.truncf %186 : vector<8x32xf32> to vector<8x32xbf16>
    %c0_74 = arith.constant 0 : index
    %c0_75 = arith.constant 0 : index
    %188 = vector.load %arg16[%c0_74, %c0_75] : memref<32x128xbf16, #tpu.memory_space<vmem>>, vector<32x128xbf16>
    %cst_76 = arith.constant dense<0.000000e+00> : vector<8x128xf32>
    %189 = tpu.matmul %187, %188, %cst_76 {dimension_numbers = #tpu.dot_dimension_numbers<[1], [0], [0], [1], [0, 0, 1, 1], [], []>} : vector<8x32xbf16>, vector<32x128xbf16>, vector<8x128xf32> -> vector<8x128xf32>
    %190 = vector.extract_strided_slice %189 {offsets = [0, 0], sizes = [8, 64], strides = [1, 1]} : vector<8x128xf32> to vector<8x64xf32>
    %191 = vector.extract_strided_slice %189 {offsets = [0, 64], sizes = [8, 64], strides = [1, 1]} : vector<8x128xf32> to vector<8x64xf32>
    %cst_77 = arith.constant 0.000000e+00 : f32
    %192 = vector.broadcast %cst_77 : f32 to vector<8x64xf32>
    %193 = arith.subf %192, %191 : vector<8x64xf32>
    %194 = math.exp %193 : vector<8x64xf32>
    %cst_78 = arith.constant 1.000000e+00 : f32
    %195 = vector.broadcast %cst_78 : f32 to vector<8x64xf32>
    %196 = arith.addf %195, %194 : vector<8x64xf32>
    %cst_79 = arith.constant 1.000000e+00 : f32
    %197 = vector.broadcast %cst_79 : f32 to vector<8x64xf32>
    %198 = arith.divf %197, %196 : vector<8x64xf32>
    %199 = arith.mulf %190, %198 : vector<8x64xf32>
    %200 = tpu.iota {dimensions = array<i32: 0>} : vector<8x1xi32>
    %cst_80 = arith.constant 0.000000e+00 : f32
    %201 = vector.broadcast %cst_80 : f32 to vector<8x64xf32>
    %c0_81 = arith.constant 0 : index
    %c0_82 = arith.constant 0 : index
    %202 = vector.load %arg17[%c0_81, %c0_82] : memref<15x64xf32, #tpu.memory_space<vmem>>, vector<1x64xf32>
    %c7_i32 = arith.constant 7 : i32
    %203 = tpu.dynamic_rotate %199 by %c7_i32 dim 0 : vector<8x64xf32>, i32 -> vector<8x64xf32>
    %c-7_i32 = arith.constant -7 : i32
    %204 = vector.broadcast %c-7_i32 : i32 to vector<8x1xi32>
    %205 = arith.addi %200, %204 : vector<8x1xi32>
    %c0_i32 = arith.constant 0 : i32
    %206 = vector.broadcast %c0_i32 : i32 to vector<8x1xi32>
    %207 = arith.cmpi sge, %205, %206 : vector<8x1xi32>
    %c-7_i32_83 = arith.constant -7 : i32
    %208 = vector.broadcast %c-7_i32_83 : i32 to vector<8x1xi32>
    %209 = arith.addi %200, %208 : vector<8x1xi32>
    %c8_i32 = arith.constant 8 : i32
    %210 = vector.broadcast %c8_i32 : i32 to vector<8x1xi32>
    %211 = arith.cmpi slt, %209, %210 : vector<8x1xi32>
    %212 = arith.andi %207, %211 : vector<8x1xi1>
    %cst_84 = arith.constant 0.000000e+00 : f32
    %213 = vector.shape_cast %212 : vector<8x1xi1> to vector<8x1xi1>
    %214 = vector.broadcast %213 : vector<8x1xi1> to vector<8x64xi1>
    %215 = vector.broadcast %cst_84 : f32 to vector<8x64xf32>
    %216 = arith.select %214, %203, %215 : vector<8x64xi1>, vector<8x64xf32>
    %217 = vector.broadcast %202 : vector<1x64xf32> to vector<8x64xf32>
    %218 = arith.mulf %216, %217 : vector<8x64xf32>
    %219 = arith.addf %201, %218 : vector<8x64xf32>
    %c1 = arith.constant 1 : index
    %c0_85 = arith.constant 0 : index
    %220 = vector.load %arg17[%c1, %c0_85] : memref<15x64xf32, #tpu.memory_space<vmem>>, vector<1x64xf32>
    %c6_i32 = arith.constant 6 : i32
    %221 = tpu.dynamic_rotate %199 by %c6_i32 dim 0 : vector<8x64xf32>, i32 -> vector<8x64xf32>
    %c-6_i32 = arith.constant -6 : i32
    %222 = vector.broadcast %c-6_i32 : i32 to vector<8x1xi32>
    %223 = arith.addi %200, %222 : vector<8x1xi32>
    %c0_i32_86 = arith.constant 0 : i32
    %224 = vector.broadcast %c0_i32_86 : i32 to vector<8x1xi32>
    %225 = arith.cmpi sge, %223, %224 : vector<8x1xi32>
    %c-6_i32_87 = arith.constant -6 : i32
    %226 = vector.broadcast %c-6_i32_87 : i32 to vector<8x1xi32>
    %227 = arith.addi %200, %226 : vector<8x1xi32>
    %c8_i32_88 = arith.constant 8 : i32
    %228 = vector.broadcast %c8_i32_88 : i32 to vector<8x1xi32>
    %229 = arith.cmpi slt, %227, %228 : vector<8x1xi32>
    %230 = arith.andi %225, %229 : vector<8x1xi1>
    %cst_89 = arith.constant 0.000000e+00 : f32
    %231 = vector.shape_cast %230 : vector<8x1xi1> to vector<8x1xi1>
    %232 = vector.broadcast %231 : vector<8x1xi1> to vector<8x64xi1>
    %233 = vector.broadcast %cst_89 : f32 to vector<8x64xf32>
    %234 = arith.select %232, %221, %233 : vector<8x64xi1>, vector<8x64xf32>
    %235 = vector.broadcast %220 : vector<1x64xf32> to vector<8x64xf32>
    %236 = arith.mulf %234, %235 : vector<8x64xf32>
    %237 = arith.addf %219, %236 : vector<8x64xf32>
    %c2 = arith.constant 2 : index
    %c0_90 = arith.constant 0 : index
    %238 = vector.load %arg17[%c2, %c0_90] : memref<15x64xf32, #tpu.memory_space<vmem>>, vector<1x64xf32>
    %c5_i32 = arith.constant 5 : i32
    %239 = tpu.dynamic_rotate %199 by %c5_i32 dim 0 : vector<8x64xf32>, i32 -> vector<8x64xf32>
    %c-5_i32 = arith.constant -5 : i32
    %240 = vector.broadcast %c-5_i32 : i32 to vector<8x1xi32>
    %241 = arith.addi %200, %240 : vector<8x1xi32>
    %c0_i32_91 = arith.constant 0 : i32
    %242 = vector.broadcast %c0_i32_91 : i32 to vector<8x1xi32>
    %243 = arith.cmpi sge, %241, %242 : vector<8x1xi32>
    %c-5_i32_92 = arith.constant -5 : i32
    %244 = vector.broadcast %c-5_i32_92 : i32 to vector<8x1xi32>
    %245 = arith.addi %200, %244 : vector<8x1xi32>
    %c8_i32_93 = arith.constant 8 : i32
    %246 = vector.broadcast %c8_i32_93 : i32 to vector<8x1xi32>
    %247 = arith.cmpi slt, %245, %246 : vector<8x1xi32>
    %248 = arith.andi %243, %247 : vector<8x1xi1>
    %cst_94 = arith.constant 0.000000e+00 : f32
    %249 = vector.shape_cast %248 : vector<8x1xi1> to vector<8x1xi1>
    %250 = vector.broadcast %249 : vector<8x1xi1> to vector<8x64xi1>
    %251 = vector.broadcast %cst_94 : f32 to vector<8x64xf32>
    %252 = arith.select %250, %239, %251 : vector<8x64xi1>, vector<8x64xf32>
    %253 = vector.broadcast %238 : vector<1x64xf32> to vector<8x64xf32>
    %254 = arith.mulf %252, %253 : vector<8x64xf32>
    %255 = arith.addf %237, %254 : vector<8x64xf32>
    %c3 = arith.constant 3 : index
    %c0_95 = arith.constant 0 : index
    %256 = vector.load %arg17[%c3, %c0_95] : memref<15x64xf32, #tpu.memory_space<vmem>>, vector<1x64xf32>
    %c4_i32 = arith.constant 4 : i32
    %257 = tpu.dynamic_rotate %199 by %c4_i32 dim 0 : vector<8x64xf32>, i32 -> vector<8x64xf32>
    %c-4_i32 = arith.constant -4 : i32
    %258 = vector.broadcast %c-4_i32 : i32 to vector<8x1xi32>
    %259 = arith.addi %200, %258 : vector<8x1xi32>
    %c0_i32_96 = arith.constant 0 : i32
    %260 = vector.broadcast %c0_i32_96 : i32 to vector<8x1xi32>
    %261 = arith.cmpi sge, %259, %260 : vector<8x1xi32>
    %c-4_i32_97 = arith.constant -4 : i32
    %262 = vector.broadcast %c-4_i32_97 : i32 to vector<8x1xi32>
    %263 = arith.addi %200, %262 : vector<8x1xi32>
    %c8_i32_98 = arith.constant 8 : i32
    %264 = vector.broadcast %c8_i32_98 : i32 to vector<8x1xi32>
    %265 = arith.cmpi slt, %263, %264 : vector<8x1xi32>
    %266 = arith.andi %261, %265 : vector<8x1xi1>
    %cst_99 = arith.constant 0.000000e+00 : f32
    %267 = vector.shape_cast %266 : vector<8x1xi1> to vector<8x1xi1>
    %268 = vector.broadcast %267 : vector<8x1xi1> to vector<8x64xi1>
    %269 = vector.broadcast %cst_99 : f32 to vector<8x64xf32>
    %270 = arith.select %268, %257, %269 : vector<8x64xi1>, vector<8x64xf32>
    %271 = vector.broadcast %256 : vector<1x64xf32> to vector<8x64xf32>
    %272 = arith.mulf %270, %271 : vector<8x64xf32>
    %273 = arith.addf %255, %272 : vector<8x64xf32>
    %c4 = arith.constant 4 : index
    %c0_100 = arith.constant 0 : index
    %274 = vector.load %arg17[%c4, %c0_100] : memref<15x64xf32, #tpu.memory_space<vmem>>, vector<1x64xf32>
    %c3_i32 = arith.constant 3 : i32
    %275 = tpu.dynamic_rotate %199 by %c3_i32 dim 0 : vector<8x64xf32>, i32 -> vector<8x64xf32>
    %c-3_i32 = arith.constant -3 : i32
    %276 = vector.broadcast %c-3_i32 : i32 to vector<8x1xi32>
    %277 = arith.addi %200, %276 : vector<8x1xi32>
    %c0_i32_101 = arith.constant 0 : i32
    %278 = vector.broadcast %c0_i32_101 : i32 to vector<8x1xi32>
    %279 = arith.cmpi sge, %277, %278 : vector<8x1xi32>
    %c-3_i32_102 = arith.constant -3 : i32
    %280 = vector.broadcast %c-3_i32_102 : i32 to vector<8x1xi32>
    %281 = arith.addi %200, %280 : vector<8x1xi32>
    %c8_i32_103 = arith.constant 8 : i32
    %282 = vector.broadcast %c8_i32_103 : i32 to vector<8x1xi32>
    %283 = arith.cmpi slt, %281, %282 : vector<8x1xi32>
    %284 = arith.andi %279, %283 : vector<8x1xi1>
    %cst_104 = arith.constant 0.000000e+00 : f32
    %285 = vector.shape_cast %284 : vector<8x1xi1> to vector<8x1xi1>
    %286 = vector.broadcast %285 : vector<8x1xi1> to vector<8x64xi1>
    %287 = vector.broadcast %cst_104 : f32 to vector<8x64xf32>
    %288 = arith.select %286, %275, %287 : vector<8x64xi1>, vector<8x64xf32>
    %289 = vector.broadcast %274 : vector<1x64xf32> to vector<8x64xf32>
    %290 = arith.mulf %288, %289 : vector<8x64xf32>
    %291 = arith.addf %273, %290 : vector<8x64xf32>
    %c5 = arith.constant 5 : index
    %c0_105 = arith.constant 0 : index
    %292 = vector.load %arg17[%c5, %c0_105] : memref<15x64xf32, #tpu.memory_space<vmem>>, vector<1x64xf32>
    %c2_i32 = arith.constant 2 : i32
    %293 = tpu.dynamic_rotate %199 by %c2_i32 dim 0 : vector<8x64xf32>, i32 -> vector<8x64xf32>
    %c-2_i32 = arith.constant -2 : i32
    %294 = vector.broadcast %c-2_i32 : i32 to vector<8x1xi32>
    %295 = arith.addi %200, %294 : vector<8x1xi32>
    %c0_i32_106 = arith.constant 0 : i32
    %296 = vector.broadcast %c0_i32_106 : i32 to vector<8x1xi32>
    %297 = arith.cmpi sge, %295, %296 : vector<8x1xi32>
    %c-2_i32_107 = arith.constant -2 : i32
    %298 = vector.broadcast %c-2_i32_107 : i32 to vector<8x1xi32>
    %299 = arith.addi %200, %298 : vector<8x1xi32>
    %c8_i32_108 = arith.constant 8 : i32
    %300 = vector.broadcast %c8_i32_108 : i32 to vector<8x1xi32>
    %301 = arith.cmpi slt, %299, %300 : vector<8x1xi32>
    %302 = arith.andi %297, %301 : vector<8x1xi1>
    %cst_109 = arith.constant 0.000000e+00 : f32
    %303 = vector.shape_cast %302 : vector<8x1xi1> to vector<8x1xi1>
    %304 = vector.broadcast %303 : vector<8x1xi1> to vector<8x64xi1>
    %305 = vector.broadcast %cst_109 : f32 to vector<8x64xf32>
    %306 = arith.select %304, %293, %305 : vector<8x64xi1>, vector<8x64xf32>
    %307 = vector.broadcast %292 : vector<1x64xf32> to vector<8x64xf32>
    %308 = arith.mulf %306, %307 : vector<8x64xf32>
    %309 = arith.addf %291, %308 : vector<8x64xf32>
    %c6 = arith.constant 6 : index
    %c0_110 = arith.constant 0 : index
    %310 = vector.load %arg17[%c6, %c0_110] : memref<15x64xf32, #tpu.memory_space<vmem>>, vector<1x64xf32>
    %c1_i32 = arith.constant 1 : i32
    %311 = tpu.dynamic_rotate %199 by %c1_i32 dim 0 : vector<8x64xf32>, i32 -> vector<8x64xf32>
    %c-1_i32 = arith.constant -1 : i32
    %312 = vector.broadcast %c-1_i32 : i32 to vector<8x1xi32>
    %313 = arith.addi %200, %312 : vector<8x1xi32>
    %c0_i32_111 = arith.constant 0 : i32
    %314 = vector.broadcast %c0_i32_111 : i32 to vector<8x1xi32>
    %315 = arith.cmpi sge, %313, %314 : vector<8x1xi32>
    %c-1_i32_112 = arith.constant -1 : i32
    %316 = vector.broadcast %c-1_i32_112 : i32 to vector<8x1xi32>
    %317 = arith.addi %200, %316 : vector<8x1xi32>
    %c8_i32_113 = arith.constant 8 : i32
    %318 = vector.broadcast %c8_i32_113 : i32 to vector<8x1xi32>
    %319 = arith.cmpi slt, %317, %318 : vector<8x1xi32>
    %320 = arith.andi %315, %319 : vector<8x1xi1>
    %cst_114 = arith.constant 0.000000e+00 : f32
    %321 = vector.shape_cast %320 : vector<8x1xi1> to vector<8x1xi1>
    %322 = vector.broadcast %321 : vector<8x1xi1> to vector<8x64xi1>
    %323 = vector.broadcast %cst_114 : f32 to vector<8x64xf32>
    %324 = arith.select %322, %311, %323 : vector<8x64xi1>, vector<8x64xf32>
    %325 = vector.broadcast %310 : vector<1x64xf32> to vector<8x64xf32>
    %326 = arith.mulf %324, %325 : vector<8x64xf32>
    %327 = arith.addf %309, %326 : vector<8x64xf32>
    %c7 = arith.constant 7 : index
    %c0_115 = arith.constant 0 : index
    %328 = vector.load %arg17[%c7, %c0_115] : memref<15x64xf32, #tpu.memory_space<vmem>>, vector<1x64xf32>
    %329 = vector.broadcast %328 : vector<1x64xf32> to vector<8x64xf32>
    %330 = arith.mulf %199, %329 : vector<8x64xf32>
    %331 = arith.addf %327, %330 : vector<8x64xf32>
    %c8_116 = arith.constant 8 : index
    %c0_117 = arith.constant 0 : index
    %332 = vector.load %arg17[%c8_116, %c0_117] : memref<15x64xf32, #tpu.memory_space<vmem>>, vector<1x64xf32>
    %c7_i32_118 = arith.constant 7 : i32
    %333 = tpu.dynamic_rotate %199 by %c7_i32_118 dim 0 : vector<8x64xf32>, i32 -> vector<8x64xf32>
    %c1_i32_119 = arith.constant 1 : i32
    %334 = vector.broadcast %c1_i32_119 : i32 to vector<8x1xi32>
    %335 = arith.addi %200, %334 : vector<8x1xi32>
    %c0_i32_120 = arith.constant 0 : i32
    %336 = vector.broadcast %c0_i32_120 : i32 to vector<8x1xi32>
    %337 = arith.cmpi sge, %335, %336 : vector<8x1xi32>
    %c1_i32_121 = arith.constant 1 : i32
    %338 = vector.broadcast %c1_i32_121 : i32 to vector<8x1xi32>
    %339 = arith.addi %200, %338 : vector<8x1xi32>
    %c8_i32_122 = arith.constant 8 : i32
    %340 = vector.broadcast %c8_i32_122 : i32 to vector<8x1xi32>
    %341 = arith.cmpi slt, %339, %340 : vector<8x1xi32>
    %342 = arith.andi %337, %341 : vector<8x1xi1>
    %cst_123 = arith.constant 0.000000e+00 : f32
    %343 = vector.shape_cast %342 : vector<8x1xi1> to vector<8x1xi1>
    %344 = vector.broadcast %343 : vector<8x1xi1> to vector<8x64xi1>
    %345 = vector.broadcast %cst_123 : f32 to vector<8x64xf32>
    %346 = arith.select %344, %333, %345 : vector<8x64xi1>, vector<8x64xf32>
    %347 = vector.broadcast %332 : vector<1x64xf32> to vector<8x64xf32>
    %348 = arith.mulf %346, %347 : vector<8x64xf32>
    %349 = arith.addf %331, %348 : vector<8x64xf32>
    %c9 = arith.constant 9 : index
    %c0_124 = arith.constant 0 : index
    %350 = vector.load %arg17[%c9, %c0_124] : memref<15x64xf32, #tpu.memory_space<vmem>>, vector<1x64xf32>
    %c6_i32_125 = arith.constant 6 : i32
    %351 = tpu.dynamic_rotate %199 by %c6_i32_125 dim 0 : vector<8x64xf32>, i32 -> vector<8x64xf32>
    %c2_i32_126 = arith.constant 2 : i32
    %352 = vector.broadcast %c2_i32_126 : i32 to vector<8x1xi32>
    %353 = arith.addi %200, %352 : vector<8x1xi32>
    %c0_i32_127 = arith.constant 0 : i32
    %354 = vector.broadcast %c0_i32_127 : i32 to vector<8x1xi32>
    %355 = arith.cmpi sge, %353, %354 : vector<8x1xi32>
    %c2_i32_128 = arith.constant 2 : i32
    %356 = vector.broadcast %c2_i32_128 : i32 to vector<8x1xi32>
    %357 = arith.addi %200, %356 : vector<8x1xi32>
    %c8_i32_129 = arith.constant 8 : i32
    %358 = vector.broadcast %c8_i32_129 : i32 to vector<8x1xi32>
    %359 = arith.cmpi slt, %357, %358 : vector<8x1xi32>
    %360 = arith.andi %355, %359 : vector<8x1xi1>
    %cst_130 = arith.constant 0.000000e+00 : f32
    %361 = vector.shape_cast %360 : vector<8x1xi1> to vector<8x1xi1>
    %362 = vector.broadcast %361 : vector<8x1xi1> to vector<8x64xi1>
    %363 = vector.broadcast %cst_130 : f32 to vector<8x64xf32>
    %364 = arith.select %362, %351, %363 : vector<8x64xi1>, vector<8x64xf32>
    %365 = vector.broadcast %350 : vector<1x64xf32> to vector<8x64xf32>
    %366 = arith.mulf %364, %365 : vector<8x64xf32>
    %367 = arith.addf %349, %366 : vector<8x64xf32>
    %c10 = arith.constant 10 : index
    %c0_131 = arith.constant 0 : index
    %368 = vector.load %arg17[%c10, %c0_131] : memref<15x64xf32, #tpu.memory_space<vmem>>, vector<1x64xf32>
    %c5_i32_132 = arith.constant 5 : i32
    %369 = tpu.dynamic_rotate %199 by %c5_i32_132 dim 0 : vector<8x64xf32>, i32 -> vector<8x64xf32>
    %c3_i32_133 = arith.constant 3 : i32
    %370 = vector.broadcast %c3_i32_133 : i32 to vector<8x1xi32>
    %371 = arith.addi %200, %370 : vector<8x1xi32>
    %c0_i32_134 = arith.constant 0 : i32
    %372 = vector.broadcast %c0_i32_134 : i32 to vector<8x1xi32>
    %373 = arith.cmpi sge, %371, %372 : vector<8x1xi32>
    %c3_i32_135 = arith.constant 3 : i32
    %374 = vector.broadcast %c3_i32_135 : i32 to vector<8x1xi32>
    %375 = arith.addi %200, %374 : vector<8x1xi32>
    %c8_i32_136 = arith.constant 8 : i32
    %376 = vector.broadcast %c8_i32_136 : i32 to vector<8x1xi32>
    %377 = arith.cmpi slt, %375, %376 : vector<8x1xi32>
    %378 = arith.andi %373, %377 : vector<8x1xi1>
    %cst_137 = arith.constant 0.000000e+00 : f32
    %379 = vector.shape_cast %378 : vector<8x1xi1> to vector<8x1xi1>
    %380 = vector.broadcast %379 : vector<8x1xi1> to vector<8x64xi1>
    %381 = vector.broadcast %cst_137 : f32 to vector<8x64xf32>
    %382 = arith.select %380, %369, %381 : vector<8x64xi1>, vector<8x64xf32>
    %383 = vector.broadcast %368 : vector<1x64xf32> to vector<8x64xf32>
    %384 = arith.mulf %382, %383 : vector<8x64xf32>
    %385 = arith.addf %367, %384 : vector<8x64xf32>
    %c11 = arith.constant 11 : index
    %c0_138 = arith.constant 0 : index
    %386 = vector.load %arg17[%c11, %c0_138] : memref<15x64xf32, #tpu.memory_space<vmem>>, vector<1x64xf32>
    %c4_i32_139 = arith.constant 4 : i32
    %387 = tpu.dynamic_rotate %199 by %c4_i32_139 dim 0 : vector<8x64xf32>, i32 -> vector<8x64xf32>
    %c4_i32_140 = arith.constant 4 : i32
    %388 = vector.broadcast %c4_i32_140 : i32 to vector<8x1xi32>
    %389 = arith.addi %200, %388 : vector<8x1xi32>
    %c0_i32_141 = arith.constant 0 : i32
    %390 = vector.broadcast %c0_i32_141 : i32 to vector<8x1xi32>
    %391 = arith.cmpi sge, %389, %390 : vector<8x1xi32>
    %c4_i32_142 = arith.constant 4 : i32
    %392 = vector.broadcast %c4_i32_142 : i32 to vector<8x1xi32>
    %393 = arith.addi %200, %392 : vector<8x1xi32>
    %c8_i32_143 = arith.constant 8 : i32
    %394 = vector.broadcast %c8_i32_143 : i32 to vector<8x1xi32>
    %395 = arith.cmpi slt, %393, %394 : vector<8x1xi32>
    %396 = arith.andi %391, %395 : vector<8x1xi1>
    %cst_144 = arith.constant 0.000000e+00 : f32
    %397 = vector.shape_cast %396 : vector<8x1xi1> to vector<8x1xi1>
    %398 = vector.broadcast %397 : vector<8x1xi1> to vector<8x64xi1>
    %399 = vector.broadcast %cst_144 : f32 to vector<8x64xf32>
    %400 = arith.select %398, %387, %399 : vector<8x64xi1>, vector<8x64xf32>
    %401 = vector.broadcast %386 : vector<1x64xf32> to vector<8x64xf32>
    %402 = arith.mulf %400, %401 : vector<8x64xf32>
    %403 = arith.addf %385, %402 : vector<8x64xf32>
    %c12 = arith.constant 12 : index
    %c0_145 = arith.constant 0 : index
    %404 = vector.load %arg17[%c12, %c0_145] : memref<15x64xf32, #tpu.memory_space<vmem>>, vector<1x64xf32>
    %c3_i32_146 = arith.constant 3 : i32
    %405 = tpu.dynamic_rotate %199 by %c3_i32_146 dim 0 : vector<8x64xf32>, i32 -> vector<8x64xf32>
    %c5_i32_147 = arith.constant 5 : i32
    %406 = vector.broadcast %c5_i32_147 : i32 to vector<8x1xi32>
    %407 = arith.addi %200, %406 : vector<8x1xi32>
    %c0_i32_148 = arith.constant 0 : i32
    %408 = vector.broadcast %c0_i32_148 : i32 to vector<8x1xi32>
    %409 = arith.cmpi sge, %407, %408 : vector<8x1xi32>
    %c5_i32_149 = arith.constant 5 : i32
    %410 = vector.broadcast %c5_i32_149 : i32 to vector<8x1xi32>
    %411 = arith.addi %200, %410 : vector<8x1xi32>
    %c8_i32_150 = arith.constant 8 : i32
    %412 = vector.broadcast %c8_i32_150 : i32 to vector<8x1xi32>
    %413 = arith.cmpi slt, %411, %412 : vector<8x1xi32>
    %414 = arith.andi %409, %413 : vector<8x1xi1>
    %cst_151 = arith.constant 0.000000e+00 : f32
    %415 = vector.shape_cast %414 : vector<8x1xi1> to vector<8x1xi1>
    %416 = vector.broadcast %415 : vector<8x1xi1> to vector<8x64xi1>
    %417 = vector.broadcast %cst_151 : f32 to vector<8x64xf32>
    %418 = arith.select %416, %405, %417 : vector<8x64xi1>, vector<8x64xf32>
    %419 = vector.broadcast %404 : vector<1x64xf32> to vector<8x64xf32>
    %420 = arith.mulf %418, %419 : vector<8x64xf32>
    %421 = arith.addf %403, %420 : vector<8x64xf32>
    %c13 = arith.constant 13 : index
    %c0_152 = arith.constant 0 : index
    %422 = vector.load %arg17[%c13, %c0_152] : memref<15x64xf32, #tpu.memory_space<vmem>>, vector<1x64xf32>
    %c2_i32_153 = arith.constant 2 : i32
    %423 = tpu.dynamic_rotate %199 by %c2_i32_153 dim 0 : vector<8x64xf32>, i32 -> vector<8x64xf32>
    %c6_i32_154 = arith.constant 6 : i32
    %424 = vector.broadcast %c6_i32_154 : i32 to vector<8x1xi32>
    %425 = arith.addi %200, %424 : vector<8x1xi32>
    %c0_i32_155 = arith.constant 0 : i32
    %426 = vector.broadcast %c0_i32_155 : i32 to vector<8x1xi32>
    %427 = arith.cmpi sge, %425, %426 : vector<8x1xi32>
    %c6_i32_156 = arith.constant 6 : i32
    %428 = vector.broadcast %c6_i32_156 : i32 to vector<8x1xi32>
    %429 = arith.addi %200, %428 : vector<8x1xi32>
    %c8_i32_157 = arith.constant 8 : i32
    %430 = vector.broadcast %c8_i32_157 : i32 to vector<8x1xi32>
    %431 = arith.cmpi slt, %429, %430 : vector<8x1xi32>
    %432 = arith.andi %427, %431 : vector<8x1xi1>
    %cst_158 = arith.constant 0.000000e+00 : f32
    %433 = vector.shape_cast %432 : vector<8x1xi1> to vector<8x1xi1>
    %434 = vector.broadcast %433 : vector<8x1xi1> to vector<8x64xi1>
    %435 = vector.broadcast %cst_158 : f32 to vector<8x64xf32>
    %436 = arith.select %434, %423, %435 : vector<8x64xi1>, vector<8x64xf32>
    %437 = vector.broadcast %422 : vector<1x64xf32> to vector<8x64xf32>
    %438 = arith.mulf %436, %437 : vector<8x64xf32>
    %439 = arith.addf %421, %438 : vector<8x64xf32>
    %c14 = arith.constant 14 : index
    %c0_159 = arith.constant 0 : index
    %440 = vector.load %arg17[%c14, %c0_159] : memref<15x64xf32, #tpu.memory_space<vmem>>, vector<1x64xf32>
    %c1_i32_160 = arith.constant 1 : i32
    %441 = tpu.dynamic_rotate %199 by %c1_i32_160 dim 0 : vector<8x64xf32>, i32 -> vector<8x64xf32>
    %c7_i32_161 = arith.constant 7 : i32
    %442 = vector.broadcast %c7_i32_161 : i32 to vector<8x1xi32>
    %443 = arith.addi %200, %442 : vector<8x1xi32>
    %c0_i32_162 = arith.constant 0 : i32
    %444 = vector.broadcast %c0_i32_162 : i32 to vector<8x1xi32>
    %445 = arith.cmpi sge, %443, %444 : vector<8x1xi32>
    %c7_i32_163 = arith.constant 7 : i32
    %446 = vector.broadcast %c7_i32_163 : i32 to vector<8x1xi32>
    %447 = arith.addi %200, %446 : vector<8x1xi32>
    %c8_i32_164 = arith.constant 8 : i32
    %448 = vector.broadcast %c8_i32_164 : i32 to vector<8x1xi32>
    %449 = arith.cmpi slt, %447, %448 : vector<8x1xi32>
    %450 = arith.andi %445, %449 : vector<8x1xi1>
    %cst_165 = arith.constant 0.000000e+00 : f32
    %451 = vector.shape_cast %450 : vector<8x1xi1> to vector<8x1xi1>
    %452 = vector.broadcast %451 : vector<8x1xi1> to vector<8x64xi1>
    %453 = vector.broadcast %cst_165 : f32 to vector<8x64xf32>
    %454 = arith.select %452, %441, %453 : vector<8x64xi1>, vector<8x64xf32>
    %455 = vector.broadcast %440 : vector<1x64xf32> to vector<8x64xf32>
    %456 = arith.mulf %454, %455 : vector<8x64xf32>
    %457 = arith.addf %439, %456 : vector<8x64xf32>
    %c0_166 = arith.constant 0 : index
    %c0_167 = arith.constant 0 : index
    %458 = vector.load %arg18[%c0_166, %c0_167] : memref<1x64xf32, #tpu.memory_space<vmem>>, vector<1x64xf32>
    %459 = vector.broadcast %458 : vector<1x64xf32> to vector<8x64xf32>
    %460 = arith.mulf %457, %459 : vector<8x64xf32>
    %c0_168 = arith.constant 0 : index
    %c0_169 = arith.constant 0 : index
    %461 = vector.load %arg19[%c0_168, %c0_169] : memref<1x64xf32, #tpu.memory_space<vmem>>, vector<1x64xf32>
    %462 = vector.broadcast %461 : vector<1x64xf32> to vector<8x64xf32>
    %463 = arith.addf %460, %462 : vector<8x64xf32>
    %cst_170 = arith.constant 0.000000e+00 : f32
    %464 = vector.broadcast %cst_170 : f32 to vector<8x64xf32>
    %465 = arith.subf %464, %463 : vector<8x64xf32>
    %466 = math.exp %465 : vector<8x64xf32>
    %cst_171 = arith.constant 1.000000e+00 : f32
    %467 = vector.broadcast %cst_171 : f32 to vector<8x64xf32>
    %468 = arith.addf %467, %466 : vector<8x64xf32>
    %cst_172 = arith.constant 1.000000e+00 : f32
    %469 = vector.broadcast %cst_172 : f32 to vector<8x64xf32>
    %470 = arith.divf %469, %468 : vector<8x64xf32>
    %471 = arith.mulf %463, %470 : vector<8x64xf32>
    %472 = arith.truncf %471 : vector<8x64xf32> to vector<8x64xbf16>
    %c0_173 = arith.constant 0 : index
    %c0_174 = arith.constant 0 : index
    %473 = vector.load %arg20[%c0_173, %c0_174] : memref<64x32xbf16, #tpu.memory_space<vmem>>, vector<64x32xbf16>
    %cst_175 = arith.constant dense<0.000000e+00> : vector<8x32xf32>
    %474 = tpu.matmul %472, %473, %cst_175 {dimension_numbers = #tpu.dot_dimension_numbers<[1], [0], [0], [1], [0, 0, 1, 1], [], []>} : vector<8x64xbf16>, vector<64x32xbf16>, vector<8x32xf32> -> vector<8x32xf32>
    %475 = arith.addf %160, %474 : vector<8x32xf32>
    %c0_176 = arith.constant 0 : index
    %c0_177 = arith.constant 0 : index
    %476 = vector.load %arg21[%c0_176, %c0_177] : memref<1x32xf32, #tpu.memory_space<vmem>>, vector<1x32xf32>
    %c0_178 = arith.constant 0 : index
    %c0_179 = arith.constant 0 : index
    %477 = vector.load %arg22[%c0_178, %c0_179] : memref<1x32xf32, #tpu.memory_space<vmem>>, vector<1x32xf32>
    %cst_180 = arith.constant dense<0.000000e+00> : vector<8xf32>
    %478 = vector.multi_reduction <add>, %475, %cst_180 [1] : vector<8x32xf32> to vector<8xf32>
    %479 = vector.shape_cast %478 : vector<8xf32> to vector<8x1xf32>
    %cst_181 = arith.constant 3.200000e+01 : f32
    %480 = vector.broadcast %cst_181 : f32 to vector<8x1xf32>
    %481 = arith.divf %479, %480 : vector<8x1xf32>
    %482 = vector.broadcast %481 : vector<8x1xf32> to vector<8x32xf32>
    %483 = arith.subf %475, %482 : vector<8x32xf32>
    %484 = vector.broadcast %481 : vector<8x1xf32> to vector<8x32xf32>
    %485 = arith.subf %475, %484 : vector<8x32xf32>
    %486 = arith.mulf %483, %485 : vector<8x32xf32>
    %cst_182 = arith.constant dense<0.000000e+00> : vector<8xf32>
    %487 = vector.multi_reduction <add>, %486, %cst_182 [1] : vector<8x32xf32> to vector<8xf32>
    %488 = vector.shape_cast %487 : vector<8xf32> to vector<8x1xf32>
    %cst_183 = arith.constant 3.200000e+01 : f32
    %489 = vector.broadcast %cst_183 : f32 to vector<8x1xf32>
    %490 = arith.divf %488, %489 : vector<8x1xf32>
    %491 = vector.broadcast %481 : vector<8x1xf32> to vector<8x32xf32>
    %492 = arith.subf %475, %491 : vector<8x32xf32>
    %cst_184 = arith.constant 9.99999974E-6 : f32
    %493 = vector.broadcast %cst_184 : f32 to vector<8x1xf32>
    %494 = arith.addf %490, %493 : vector<8x1xf32>
    %495 = math.rsqrt %494 : vector<8x1xf32>
    %496 = vector.broadcast %495 : vector<8x1xf32> to vector<8x32xf32>
    %497 = arith.mulf %492, %496 : vector<8x32xf32>
    %498 = vector.broadcast %476 : vector<1x32xf32> to vector<8x32xf32>
    %499 = arith.mulf %497, %498 : vector<8x32xf32>
    %500 = vector.broadcast %477 : vector<1x32xf32> to vector<8x32xf32>
    %501 = arith.addf %499, %500 : vector<8x32xf32>
    %502 = arith.truncf %501 : vector<8x32xf32> to vector<8x32xbf16>
    %c0_185 = arith.constant 0 : index
    %c0_186 = arith.constant 0 : index
    %503 = vector.load %arg23[%c0_185, %c0_186] : memref<32x128xbf16, #tpu.memory_space<vmem>>, vector<32x128xbf16>
    %cst_187 = arith.constant dense<0.000000e+00> : vector<8x128xf32>
    %504 = tpu.matmul %502, %503, %cst_187 {dimension_numbers = #tpu.dot_dimension_numbers<[1], [0], [0], [1], [0, 0, 1, 1], [], []>} : vector<8x32xbf16>, vector<32x128xbf16>, vector<8x128xf32> -> vector<8x128xf32>
    %c0_188 = arith.constant 0 : index
    %c0_189 = arith.constant 0 : index
    %505 = vector.load %arg24[%c0_188, %c0_189] : memref<1x128xf32, #tpu.memory_space<vmem>>, vector<1x128xf32>
    %506 = vector.broadcast %505 : vector<1x128xf32> to vector<8x128xf32>
    %507 = arith.addf %504, %506 : vector<8x128xf32>
    %cst_190 = arith.constant 0.000000e+00 : f32
    %508 = vector.broadcast %cst_190 : f32 to vector<8x128xf32>
    %509 = arith.maximumf %507, %508 : vector<8x128xf32>
    %510 = arith.truncf %509 : vector<8x128xf32> to vector<8x128xbf16>
    %c0_191 = arith.constant 0 : index
    %c0_192 = arith.constant 0 : index
    %511 = vector.load %arg25[%c0_191, %c0_192] : memref<128x32xbf16, #tpu.memory_space<vmem>>, vector<128x32xbf16>
    %cst_193 = arith.constant dense<0.000000e+00> : vector<8x32xf32>
    %512 = tpu.matmul %510, %511, %cst_193 {dimension_numbers = #tpu.dot_dimension_numbers<[1], [0], [0], [1], [0, 0, 1, 1], [], []>} : vector<8x128xbf16>, vector<128x32xbf16>, vector<8x32xf32> -> vector<8x32xf32>
    %c0_194 = arith.constant 0 : index
    %c0_195 = arith.constant 0 : index
    %513 = vector.load %arg26[%c0_194, %c0_195] : memref<1x32xf32, #tpu.memory_space<vmem>>, vector<1x32xf32>
    %514 = vector.broadcast %513 : vector<1x32xf32> to vector<8x32xf32>
    %515 = arith.addf %512, %514 : vector<8x32xf32>
    %cst_196 = arith.constant 5.000000e-01 : f32
    %516 = vector.broadcast %cst_196 : f32 to vector<8x32xf32>
    %517 = arith.mulf %516, %515 : vector<8x32xf32>
    %518 = arith.addf %475, %517 : vector<8x32xf32>
    %c0_197 = arith.constant 0 : index
    %c0_198 = arith.constant 0 : index
    %519 = vector.load %arg27[%c0_197, %c0_198] : memref<1x32xf32, #tpu.memory_space<vmem>>, vector<1x32xf32>
    %c0_199 = arith.constant 0 : index
    %c0_200 = arith.constant 0 : index
    %520 = vector.load %arg28[%c0_199, %c0_200] : memref<1x32xf32, #tpu.memory_space<vmem>>, vector<1x32xf32>
    %cst_201 = arith.constant dense<0.000000e+00> : vector<8xf32>
    %521 = vector.multi_reduction <add>, %518, %cst_201 [1] : vector<8x32xf32> to vector<8xf32>
    %522 = vector.shape_cast %521 : vector<8xf32> to vector<8x1xf32>
    %cst_202 = arith.constant 3.200000e+01 : f32
    %523 = vector.broadcast %cst_202 : f32 to vector<8x1xf32>
    %524 = arith.divf %522, %523 : vector<8x1xf32>
    %525 = vector.broadcast %524 : vector<8x1xf32> to vector<8x32xf32>
    %526 = arith.subf %518, %525 : vector<8x32xf32>
    %527 = vector.broadcast %524 : vector<8x1xf32> to vector<8x32xf32>
    %528 = arith.subf %518, %527 : vector<8x32xf32>
    %529 = arith.mulf %526, %528 : vector<8x32xf32>
    %cst_203 = arith.constant dense<0.000000e+00> : vector<8xf32>
    %530 = vector.multi_reduction <add>, %529, %cst_203 [1] : vector<8x32xf32> to vector<8xf32>
    %531 = vector.shape_cast %530 : vector<8xf32> to vector<8x1xf32>
    %cst_204 = arith.constant 3.200000e+01 : f32
    %532 = vector.broadcast %cst_204 : f32 to vector<8x1xf32>
    %533 = arith.divf %531, %532 : vector<8x1xf32>
    %534 = vector.broadcast %524 : vector<8x1xf32> to vector<8x32xf32>
    %535 = arith.subf %518, %534 : vector<8x32xf32>
    %cst_205 = arith.constant 9.99999974E-6 : f32
    %536 = vector.broadcast %cst_205 : f32 to vector<8x1xf32>
    %537 = arith.addf %533, %536 : vector<8x1xf32>
    %538 = math.rsqrt %537 : vector<8x1xf32>
    %539 = vector.broadcast %538 : vector<8x1xf32> to vector<8x32xf32>
    %540 = arith.mulf %535, %539 : vector<8x32xf32>
    %541 = vector.broadcast %519 : vector<1x32xf32> to vector<8x32xf32>
    %542 = arith.mulf %540, %541 : vector<8x32xf32>
    %543 = vector.broadcast %520 : vector<1x32xf32> to vector<8x32xf32>
    %544 = arith.addf %542, %543 : vector<8x32xf32>
    %c0_206 = arith.constant 0 : index
    %c0_207 = arith.constant 0 : index
    %c0_208 = arith.constant 0 : index
    %545 = vector.load %arg29[%c0_206, %c0_207, %c0_208] : memref<1x8x32xf32, #tpu.memory_space<vmem>>, vector<1x8x32xf32>
    %546 = vector.shape_cast %545 : vector<1x8x32xf32> to vector<8x32xf32>
    %547 = vector.shape_cast %544 : vector<8x32xf32> to vector<1x8x32xf32>
    tpu.vector_store %arg29[%c0_206, %c0_207, %c0_208], %547 {strides = array<i32>} : memref<1x8x32xf32, #tpu.memory_space<vmem>>, vector<1x8x32xf32>,
    return
  }
  func.func @transform_0(%arg0: i32) -> (i32, i32, i32) {
    %c0_i32 = arith.constant 0 : i32
    %c0_i32_0 = arith.constant 0 : i32
    %c0_i32_1 = arith.constant 0 : i32
    return %arg0, %c0_i32, %c0_i32_0 : i32, i32, i32
  }
  func.func @transform_1(%arg0: i32) -> (i32, i32) {
    %c0_i32 = arith.constant 0 : i32
    %c0_i32_0 = arith.constant 0 : i32
    %c0_i32_1 = arith.constant 0 : i32
    return %c0_i32, %c0_i32_0 : i32, i32
  }
  func.func @transform_2(%arg0: i32) -> (i32, i32) {
    %c0_i32 = arith.constant 0 : i32
    %c0_i32_0 = arith.constant 0 : i32
    %c0_i32_1 = arith.constant 0 : i32
    return %c0_i32, %c0_i32_0 : i32, i32
  }
  func.func @transform_3(%arg0: i32) -> (i32, i32) {
    %c0_i32 = arith.constant 0 : i32
    %c0_i32_0 = arith.constant 0 : i32
    %c0_i32_1 = arith.constant 0 : i32
    return %c0_i32, %c0_i32_0 : i32, i32
  }
  func.func @transform_4(%arg0: i32) -> (i32, i32) {
    %c0_i32 = arith.constant 0 : i32
    %c0_i32_0 = arith.constant 0 : i32
    %c0_i32_1 = arith.constant 0 : i32
    return %c0_i32, %c0_i32_0 : i32, i32
  }
  func.func @transform_5(%arg0: i32) -> (i32, i32) {
    %c0_i32 = arith.constant 0 : i32
    %c0_i32_0 = arith.constant 0 : i32
    %c0_i32_1 = arith.constant 0 : i32
    return %c0_i32, %c0_i32_0 : i32, i32
  }
  func.func @transform_6(%arg0: i32) -> (i32, i32) {
    %c0_i32 = arith.constant 0 : i32
    %c0_i32_0 = arith.constant 0 : i32
    %c0_i32_1 = arith.constant 0 : i32
    return %c0_i32, %c0_i32_0 : i32, i32
  }
  func.func @transform_7(%arg0: i32) -> (i32, i32) {
    %c0_i32 = arith.constant 0 : i32
    %c0_i32_0 = arith.constant 0 : i32
    %c0_i32_1 = arith.constant 0 : i32
    return %c0_i32, %c0_i32_0 : i32, i32
  }
  func.func @transform_8(%arg0: i32) -> (i32, i32) {
    %c0_i32 = arith.constant 0 : i32
    %c0_i32_0 = arith.constant 0 : i32
    %c0_i32_1 = arith.constant 0 : i32
    return %c0_i32, %c0_i32_0 : i32, i32
  }
  func.func @transform_9(%arg0: i32) -> (i32, i32) {
    %c0_i32 = arith.constant 0 : i32
    %c0_i32_0 = arith.constant 0 : i32
    %c0_i32_1 = arith.constant 0 : i32
    return %c0_i32, %c0_i32_0 : i32, i32
  }
  func.func @transform_10(%arg0: i32) -> (i32, i32) {
    %c0_i32 = arith.constant 0 : i32
    %c0_i32_0 = arith.constant 0 : i32
    %c0_i32_1 = arith.constant 0 : i32
    return %c0_i32, %c0_i32_0 : i32, i32
  }
  func.func @transform_11(%arg0: i32) -> (i32, i32) {
    %c0_i32 = arith.constant 0 : i32
    %c0_i32_0 = arith.constant 0 : i32
    %c0_i32_1 = arith.constant 0 : i32
    return %c0_i32, %c0_i32_0 : i32, i32
  }
  func.func @transform_12(%arg0: i32) -> (i32, i32) {
    %c0_i32 = arith.constant 0 : i32
    %c0_i32_0 = arith.constant 0 : i32
    %c0_i32_1 = arith.constant 0 : i32
    return %c0_i32, %c0_i32_0 : i32, i32
  }
  func.func @transform_13(%arg0: i32) -> (i32, i32) {
    %c0_i32 = arith.constant 0 : i32
    %c0_i32_0 = arith.constant 0 : i32
    %c0_i32_1 = arith.constant 0 : i32
    return %c0_i32, %c0_i32_0 : i32, i32
  }
  func.func @transform_14(%arg0: i32) -> (i32, i32) {
    %c0_i32 = arith.constant 0 : i32
    %c0_i32_0 = arith.constant 0 : i32
    %c0_i32_1 = arith.constant 0 : i32
    return %c0_i32, %c0_i32_0 : i32, i32
  }
  func.func @transform_15(%arg0: i32) -> (i32, i32) {
    %c0_i32 = arith.constant 0 : i32
    %c0_i32_0 = arith.constant 0 : i32
    %c0_i32_1 = arith.constant 0 : i32
    return %c0_i32, %c0_i32_0 : i32, i32
  }
  func.func @transform_16(%arg0: i32) -> (i32, i32) {
    %c0_i32 = arith.constant 0 : i32
    %c0_i32_0 = arith.constant 0 : i32
    %c0_i32_1 = arith.constant 0 : i32
    return %c0_i32, %c0_i32_0 : i32, i32
  }
  func.func @transform_17(%arg0: i32) -> (i32, i32) {
    %c0_i32 = arith.constant 0 : i32
    %c0_i32_0 = arith.constant 0 : i32
    %c0_i32_1 = arith.constant 0 : i32
    return %c0_i32, %c0_i32_0 : i32, i32
  }
  func.func @transform_18(%arg0: i32) -> (i32, i32) {
    %c0_i32 = arith.constant 0 : i32
    %c0_i32_0 = arith.constant 0 : i32
    %c0_i32_1 = arith.constant 0 : i32
    return %c0_i32, %c0_i32_0 : i32, i32
  }
  func.func @transform_19(%arg0: i32) -> (i32, i32) {
    %c0_i32 = arith.constant 0 : i32
    %c0_i32_0 = arith.constant 0 : i32
    %c0_i32_1 = arith.constant 0 : i32
    return %c0_i32, %c0_i32_0 : i32, i32
  }
  func.func @transform_20(%arg0: i32) -> (i32, i32) {
    %c0_i32 = arith.constant 0 : i32
    %c0_i32_0 = arith.constant 0 : i32
    %c0_i32_1 = arith.constant 0 : i32
    return %c0_i32, %c0_i32_0 : i32, i32
  }
  func.func @transform_21(%arg0: i32) -> (i32, i32) {
    %c0_i32 = arith.constant 0 : i32
    %c0_i32_0 = arith.constant 0 : i32
    %c0_i32_1 = arith.constant 0 : i32
    return %c0_i32, %c0_i32_0 : i32, i32
  }
  func.func @transform_22(%arg0: i32) -> (i32, i32) {
    %c0_i32 = arith.constant 0 : i32
    %c0_i32_0 = arith.constant 0 : i32
    %c0_i32_1 = arith.constant 0 : i32
    return %c0_i32, %c0_i32_0 : i32, i32
  }
  func.func @transform_23(%arg0: i32) -> (i32, i32) {
    %c0_i32 = arith.constant 0 : i32
    %c0_i32_0 = arith.constant 0 : i32
    %c0_i32_1 = arith.constant 0 : i32
    return %c0_i32, %c0_i32_0 : i32, i32
  }
  func.func @transform_24(%arg0: i32) -> (i32, i32) {
    %c0_i32 = arith.constant 0 : i32
    %c0_i32_0 = arith.constant 0 : i32
    %c0_i32_1 = arith.constant 0 : i32
    return %c0_i32, %c0_i32_0 : i32, i32
  }
  func.func @transform_25(%arg0: i32) -> (i32, i32) {
    %c0_i32 = arith.constant 0 : i32
    %c0_i32_0 = arith.constant 0 : i32
    %c0_i32_1 = arith.constant 0 : i32
    return %c0_i32, %c0_i32_0 : i32, i32
  }
  func.func @transform_26(%arg0: i32) -> (i32, i32) {
    %c0_i32 = arith.constant 0 : i32
    %c0_i32_0 = arith.constant 0 : i32
    %c0_i32_1 = arith.constant 0 : i32
    return %c0_i32, %c0_i32_0 : i32, i32
  }
  func.func @transform_27(%arg0: i32) -> (i32, i32) {
    %c0_i32 = arith.constant 0 : i32
    %c0_i32_0 = arith.constant 0 : i32
    %c0_i32_1 = arith.constant 0 : i32
    return %c0_i32, %c0_i32_0 : i32, i32
  }
  func.func @transform_28(%arg0: i32) -> (i32, i32, i32) {
    %c0_i32 = arith.constant 0 : i32
    %c0_i32_0 = arith.constant 0 : i32
    %c0_i32_1 = arith.constant 0 : i32
    return %arg0, %c0_i32, %c0_i32_0 : i32, i32, i32
  }
}

</mosaic_0001>

<bundles_post_ra>
// kernel: conformer_forward.2
= control target key start
LH: loop header
LB: loop body
LE: loop exit
PB: predicated region body
PF: predicated region fallthrough
CT: control target
= control target key end

     0   :  { %s2695_s0 = inlined_call_operand.vmem [shape: f32[2,8,32], index: 0, kind: input, shape index: {}, may-alias: {0,28}]   ;;  %s2696_s1 = inlined_call_operand.vmem [shape: f32[1,32], index: 1, kind: input, shape index: {}]   ;;  %s2697_s2 = inlined_call_operand.vmem [shape: f32[1,32], index: 2, kind: input, shape index: {}]   ;;  %s2698_s3 = inlined_call_operand.vmem [shape: bf16[32,128], index: 3, kind: input, shape index: {}]   ;;  %s2699_s4 = inlined_call_operand.vmem [shape: f32[1,128], index: 4, kind: input, shape index: {}]   ;;  %s2700_s5 = inlined_call_operand.vmem [shape: bf16[128,32], index: 5, kind: input, shape index: {}]   ;;  %s2701_s6 = inlined_call_operand.vmem [shape: f32[1,32], index: 6, kind: input, shape index: {}]   ;;  %s2702_s7 = inlined_call_operand.vmem [shape: f32[1,32], index: 7, kind: input, shape index: {}]   ;;  %s2703_s8 = inlined_call_operand.vmem [shape: f32[1,32], index: 8, kind: input, shape index: {}]   ;;  %s2704_s9 = inlined_call_operand.vmem [shape: bf16[32,96], index: 9, kind: input, shape index: {}]   ;;  %s2705_s10 = inlined_call_operand.vmem [shape: f32[1,96], index: 10, kind: input, shape index: {}]   ;;  %s2706_s11 = inlined_call_operand.vmem [shape: bf16[32,32], index: 11, kind: input, shape index: {}]   ;;  %s2707_s12 = inlined_call_operand.vmem [shape: f32[1,32], index: 12, kind: input, shape index: {}]   ;;  %s2708_s13 = inlined_call_operand.vmem [shape: f32[1,32], index: 13, kind: input, shape index: {}]   ;;  %s2709_s14 = inlined_call_operand.vmem [shape: f32[1,32], index: 14, kind: input, shape index: {}]   ;;  %s2710_s15 = inlined_call_operand.vmem [shape: bf16[32,128], index: 15, kind: input, shape index: {}]   ;;  %s2711_s16 = inlined_call_operand.vmem [shape: f32[15,64], index: 16, kind: input, shape index: {}]   ;;  %s2712_s17 = inlined_call_operand.vmem [shape: f32[1,64], index: 17, kind: input, shape index: {}]   ;;  %s2713_s18 = inlined_call_operand.vmem [shape: f32[1,64], index: 18, kind: input, shape index: {}]   ;;  %s2714_s19 = inlined_call_operand.vmem [shape: bf16[64,32], index: 19, kind: input, shape index: {}]   ;;  %s2715_s20 = inlined_call_operand.vmem [shape: f32[1,32], index: 20, kind: input, shape index: {}]   ;;  %s2716_s21 = inlined_call_operand.vmem [shape: f32[1,32], index: 21, kind: input, shape index: {}]   ;;  %s2717_s22 = inlined_call_operand.vmem [shape: bf16[32,128], index: 22, kind: input, shape index: {}]   ;;  %s2718_s23 = inlined_call_operand.vmem [shape: f32[1,128], index: 23, kind: input, shape index: {}]   ;;  %s2719_s24 = inlined_call_operand.vmem [shape: bf16[128,32], index: 24, kind: input, shape index: {}]   ;;  %s2720_s25 = inlined_call_operand.vmem [shape: f32[1,32], index: 25, kind: input, shape index: {}]   ;;  %s2721_s26 = inlined_call_operand.vmem [shape: f32[1,32], index: 26, kind: input, shape index: {}]   ;;  %s2722_s27 = inlined_call_operand.vmem [shape: f32[1,32], index: 27, kind: input, shape index: {}]   ;;  %s2723_s28 = inlined_call_operand.vmem [shape: f32[2,8,32], index: 28, kind: output, shape index: {}, may-alias: {0,28}]  }
   0x1   :  { %2729 = sst [smem:[#allocation3_spill]] %s2695_s0 }
   0x2   :  { %2730 = sst [smem:[#allocation4_spill]] %s2696_s1 }
   0x3   :  { %2731 = sst [smem:[#allocation5_spill]] %s2697_s2 }
   0x4   :  { %2732 = sst [smem:[#allocation6_spill]] %s2698_s3 }
   0x5   :  { %2733 = sst [smem:[#allocation7_spill]] %s2699_s4 }
   0x6   :  { %2734 = sst [smem:[#allocation8_spill]] %s2700_s5 }
   0x7   :  { %2735 = sst [smem:[#allocation9_spill]] %s2701_s6 }
   0x8   :  { %2736 = sst [smem:[#allocation10_spill]] %s2702_s7 }
   0x9   :  { %2737 = sst [smem:[#allocation11_spill]] %s2703_s8  ;;  %s2376_s8 = smov 0  }
   0xa   :  { %2738 = sst [smem:[#allocation12_spill]] %s2704_s9 }
   0xb   :  { %2739 = sst [smem:[#allocation13_spill]] %s2705_s10 }
   0xc   :  { %2740 = sst [smem:[#allocation14_spill]] %s2706_s11 }
   0xd   :  { %2741 = sst [smem:[#allocation15_spill]] %s2707_s12 }
   0xe LB: > { %s1943_s5 = sadd.s32 4294967295, %s2214_s8   ;;  %p1947_p0 = scmp.ge.s32.totalorder %s2214_s8, 1  ;;  %s2214_s8 = sphi %s2376_s8, %s38_s8  }
   0xf   : > { %p761_p1 = scmp.lt.s32.totalorder %s2214_s8, 3 }
  0x11   : > { %p762_p2 = pnand %p1947_p0, %p761_p1 }
  0x12   : > { %p833_p3 = scmp.lt.s32.totalorder (!%p762_p2), %s1943_s5, 1  ;;  %s2742_s6 = sld [smem:[#allocation3_spill]] (!%p762_p2) }
  0x13   : > { %765 = sbr.rel (%p762_p2) target bundleno = 3835 (0xefb), region = 132  ;;  %s2743_s29 = sld [smem:[#allocation6_spill]] (!%p762_p2) }
  0x14   : > { %s2744_s4 = sld [smem:[#allocation8_spill]] (!%p762_p2)  ;;  %s2217_s3 = smov (!%p762_p2), 96  }
  0x15   : > { %s2746_s11 = sld [smem:[#allocation5_spill]] (!%p762_p2)  ;;  %s2220_s0 = smov (!%p762_p2), 64  }
  0x16   : > { %s2749_s12 = sld [smem:[#allocation12_spill]] (!%p762_p2)  ;;  %s2223_s7 = smov (!%p762_p2), 104  }
  0x17   : > { %s2751_s2 = sld [smem:[#allocation11_spill]] (!%p762_p2)  ;;  %s2224_s1 = smov (!%p762_p2), 112  }
  0x18   : > { %s2757_s5 = smov (!%p833_p3, %s1943_s5), 1  ;;  %vm845_vm0 = vcmask 261120   ;;  %v2216_v2 = vmov 32.0   ;;  %s2752_s30 = sld [smem:[#allocation13_spill]]  ;;  %vm1082_vm8 = vcmask 64512   ;;  %vm1119_vm9 = vcmask 1043456  }
  0x19   : > { %s2728_s9 = sshll.u32 %s2757_s5, 3  ;;  %2172 = vrcp.f32 %v2216_v2  ;;  %v2087_v14 = vld [vmem:[%s2743_s29 + $0x8] sm:$0xff]  ;;  %v2086_v15 = vld [vmem:[%s2743_s29] sm:$0xff]  ;;  %vm1200_vm10 = vcmask 130112   ;;  %vm1262_vm11 = vcmask 195712   ;;  %vm1324_vm12 = vcmask 261312  }
  0x1a   : > { %s836_s10 = scalar_lea.vmem %s2742_s6, %s2728_s9  ;;  %913 = vmatpush.bf16.msra.mxu2 %v2087_v14  ;;  %v2095_v16 = vld [vmem:[%s2744_s4 + $0x38] sm:$0xff]  ;;  %v2094_v19 = vld [vmem:[%s2744_s4 + $0x30] sm:$0xff]  ;;  %v2093_v21 = vld [vmem:[%s2744_s4 + $0x28] sm:$0xff]  ;;  %s2745_s6 = sld [smem:[#allocation4_spill]] }
  0x1b   : > { %v2392_v0 = vld [vmem:[%s836_s10] sm:$0xff]  ;;  %990 = vmatpush.bf16.msra.mxu1 %v2095_v16  ;;  %v2091_v25 = vld [vmem:[%s2744_s4 + $0x18] sm:$0xff]  ;;  %v2090_v28 = vld [vmem:[%s2744_s4 + $0x10] sm:$0xff]  ;;  %s2750_s10 = sld [smem:[#allocation10_spill]] }
  0x1c   : > { %v846_v1 = vsel %vm845_vm0, %v2392_v0, 0.0  ;;  %v2092_v22 = vld [vmem:[%s2744_s4 + $0x20] sm:$0xff]  ;;  %v2089_v38 = vld [vmem:[%s2744_s4 + $0x8] sm:$0xff] }
  0x1d   : > { %847 = vadd.xlane.f32.xlu0 %v846_v1  ;;  %v2140_v34 = vld [vmem:[%s2746_s11] ss:$0 sm:$0xff]  ;;  %s2748_s11 = sld [smem:[#allocation9_spill]]  ;;  %v2097_v58 = vld [vmem:[%s2749_s12 + $0x8] sm:$0xff] }
  0x1e   : > { %914 = vmatpush.bf16.msra.mxu2 %v2086_v15  ;;  %v2088_v39 = vld [vmem:[%s2744_s4] sm:$0xff] }
  0x1f   : > { %v2173_v3 = vpop.eup %2172  ;;  %991 = vmatpush.bf16.msra.mxu1 %v2094_v19  ;;  %v2096_v59 = vld [vmem:[%s2749_s12] sm:$0xff] }
  0x20   : > { %v850_v4 = vmul.f32 32.0, %v2173_v3  ;;  %vm854_vm1 = vweird.f32 %v2173_v3  ;;  %v2139_v31 = vld [vmem:[%s2745_s6] ss:$0 sm:$0xff]  ;;  %s2747_s6 = sld [smem:[#allocation7_spill]] }
  0x22   : > { %v851_v5 = vsub.f32 1.0, %v850_v4  ;;  %1067 = vmatpush.bf16.msrb.mxu2 %v2097_v58 }
  0x23   : > { %992 = vmatpush.bf16.msra.mxu1 %v2093_v21  ;;  %v2142_v46 = vld [vmem:[%s2748_s11] ss:$0 sm:$0xff]  ;;  %s2221_s11 = smov 80  }
  0x24   : > { %v852_v6 = vmul.f32 %v2173_v3, %v851_v5  ;;  %v2143_v5 = vld [vmem:[%s2750_s10] ss:$0 sm:$0xff]  ;;  %s2219_s10 = smov 88  }
  0x26   : > { %v853_v7 = vadd.f32 %v2173_v3, %v852_v6  ;;  %v2141_v40 = vld [vmem:[%s2747_s6] ss:$0 sm:$0xff]  ;;  %1068 = vmatpush.bf16.msrb.mxu2 %v2096_v59  ;;  %s2218_s6 = smov 120  }
  0x27   : > { %993 = vmatpush.bf16.msra.mxu1 %v2092_v22 }
  0x28   : > { %v2396_v8 = vsel %vm854_vm1, %v2173_v3, %v853_v7 }
  0x2b   : > { %994 = vmatpush.bf16.msra.mxu1 %v2091_v25 }
  0x2f   : > { %995 = vmatpush.bf16.msra.mxu1 %v2090_v28 }
  0x33   : > { %996 = vmatpush.bf16.msra.mxu1 %v2089_v38 }
  0x37   : > { %997 = vmatpush.bf16.msra.mxu1 %v2088_v39 }
  0x90   : > { %v848_v9 = vpop.xlane.xlu0 %847 }
  0x91   : > { %v856_v10 = vmul.f32 %v2396_v8, %v848_v9  ;;  %v2144_v9 = vld [vmem:[%s2751_s2] ss:$0 sm:$0xff]  ;;  %s2222_s2 = smov 72  }
  0x93   : > { %v857_v11 = vsub.f32 %v2392_v0, %v856_v10 }
  0x95   : > { %v858_v12 = vmul.f32 %v857_v11, %v857_v11 }
  0x97   : > { %v859_v13 = vsel %vm845_vm0, %v858_v12, 0.0 }
  0x98   : > { %860 = vadd.xlane.f32.xlu0 %v859_v13  ;;  %v2145_v13 = vld [vmem:[%s2752_s30] ss:$0 sm:$0xff]  ;;  %s2225_s30 = smov 56  }
 0x10b   : > { %v861_v17 = vpop.xlane.xlu0 %860 }
 0x10c   : > { %v862_v18 = vmul.f32 %v861_v17, %v2396_v8 }
 0x10e   : > { %v863_v20 = vadd.f32 1e-05, %v862_v18 }
 0x110   : > { %2174 = vrsqrt.f32 %v863_v20  ;;  %vm870_vm3 = vweird.f32 %v863_v20 }
 0x116   : > { %v2175_v23 = vpop.eup %2174 }
 0x117   : > { %v865_v24 = vmul.f32 %v2175_v23, %v863_v20  ;;  %vm871_vm2 = vweird.f32 %v2175_v23 }
 0x118   : > { %vm872_vm4 = vmor %vm870_vm3, %vm871_vm2 }
 0x119   : > { %v866_v26 = vmul.f32 %v2175_v23, %v865_v24 }
 0x11b   : > { %v867_v27 = vmul.f32 0.5, %v866_v26 }
 0x11d   : > { %v868_v29 = vsub.f32 1.5, %v867_v27 }
 0x11f   : > { %v869_v30 = vmul.f32 %v2175_v23, %v868_v29 }
 0x121   : > { %v873_v32 = vsel %vm872_vm4, %v2175_v23, %v869_v30 }
 0x122   : > { %v874_v33 = vmul.f32 %v873_v32, %v857_v11 }
 0x124   : > { %v878_v35 = vmul.f32 %v2139_v31, %v874_v33 }
 0x126   : > { %v882_v36 = vadd.f32 %v2140_v34, %v878_v35 }
 0x128   : > { %v883_v37 = vpack.c.bf16 %v882_v36, %v882_v36 }
 0x12a   : > { %1958 = vmatmul.msk.bf16.vlgmr.msra.gmra.mxu2 %vm845_vm0, %v883_v37 }
 0x1ad   : > { %v916_v41 = vpop.f32.mrf.mxu2 }
 0x1ae   : > { %v917_v42 = vadd.f32 %v2141_v40, %v916_v41 }
 0x1b0   : > { %v920_v43 = vmax.f32 %v917_v42, 0.0 }
 0x1b2   : > { %v921_v44 = vpack.c.bf16 %v920_v43, %v920_v43 }
 0x1b4   : > { %998 = vmatmul.bf16.vlgmr.msra.gmra.mxu1 %v921_v44 }
 0x1b5   : > { %v918_v45 = vpop.f32.mrf.mxu2 }
 0x231   : > { %v999_v47 = vpop.f32.mrf.mxu1 }
 0x232   : > { %v1000_v48 = vadd.f32 %v2142_v46, %v999_v47 }
 0x234   : > { %v1003_v49 = vmul.f32 0.5, %v1000_v48 }
 0x236   : > { %v1004_v50 = vadd.f32 %v1003_v49, %v2392_v0 }
 0x238   : > { %v1007_v51 = vsel %vm845_vm0, %v1004_v50, 0.0 }
 0x239   : > { %v1001_v52 = vpop.f32.mrf.mxu1  ;;  %1008 = vadd.xlane.f32.xlu1 %v1007_v51 }
 0x2ac   : > { %v1009_v53 = vpop.xlane.xlu1 %1008 }
 0x2ad   : > { %v1010_v54 = vmul.f32 %v1009_v53, %v2396_v8 }
 0x2af   : > { %v1011_v55 = vsub.f32 %v1004_v50, %v1010_v54 }
 0x2b1   : > { %v1012_v56 = vmul.f32 %v1011_v55, %v1011_v55 }
 0x2b3   : > { %v1013_v57 = vsel %vm845_vm0, %v1012_v56, 0.0 }
 0x2b4   : > { %1014 = vadd.xlane.f32.xlu1 %v1013_v57 }
 0x327   : > { %v1015_v60 = vpop.xlane.xlu1 %1014 }
 0x328   : > { %v1016_v61 = vmul.f32 %v1015_v60, %v2396_v8 }
 0x32a   : > { %v1017_v62 = vadd.f32 1e-05, %v1016_v61 }
 0x32c   : > { %2176 = vrsqrt.f32 %v1017_v62  ;;  %vm1024_vm6 = vweird.f32 %v1017_v62 }
 0x332   : > { %v2177_v63 = vpop.eup %2176 }
 0x333   : > { %v1019_v0 = vmul.f32 %v2177_v63, %v1017_v62  ;;  %vm1025_vm5 = vweird.f32 %v2177_v63 }
 0x334   : > { %vm1026_vm7 = vmor %vm1024_vm6, %vm1025_vm5 }
 0x335   : > { %v1020_v1 = vmul.f32 %v2177_v63, %v1019_v0 }
 0x337   : > { %v1021_v2 = vmul.f32 0.5, %v1020_v1 }
 0x339   : > { %v1022_v3 = vsub.f32 1.5, %v1021_v2 }
 0x33b   : > { %v1023_v4 = vmul.f32 %v2177_v63, %v1022_v3 }
 0x33d   : > { %v1027_v6 = vsel %vm1026_vm7, %v2177_v63, %v1023_v4 }
 0x33e   : > { %v1028_v7 = vmul.f32 %v1027_v6, %v1011_v55 }
 0x340   : > { %v1032_v10 = vmul.f32 %v2143_v5, %v1028_v7 }
 0x342   : > { %v2462_v11 = vadd.f32 %v2144_v9, %v1032_v10 }
 0x344   : > { %v1037_v12 = vpack.c.bf16 %v2462_v11, %v2462_v11 }
 0x346   : > { %1999 = vmatmul.msk.bf16.vlgmr.msrb.gmra.mxu2 %vm845_vm0, %v1037_v12 }
 0x3c9   : > { %v1070_v14 = vpop.f32.mrf.mxu2 }
 0x3ca   : > { %v1071_v15 = vadd.f32 %v2145_v13, %v1070_v14 }
 0x3cc   : > { %v1074_v16 = vmul.f32 0.35355338, %v1071_v15  ;;  %v1076_v17 = vpack.c.bf16 %v1071_v15, %v1071_v15 }
 0x3ce   : > { %v1075_v18 = vpack.c.bf16 %v1074_v16, %v1074_v16  ;;  %v1078_v19 = vunpack.c.l.b16 %v1076_v17 }
 0x3d0   : > { %v2470_v20 = vpack.c.b16 %v1078_v19, %v1078_v19  ;;  %v1138_v21 = vunpack.c.l.b16 %v1075_v18 }
 0x3d1   : > { %v1072_v22 = vpop.f32.mrf.mxu2 }
 0x3d2   : > { %1080 = vrot.lane.b32.xlu2 %v2470_v20, %s2217_s3  ;;  %v1139_v23 = vpack.c.b16 %v1138_v21, %v1138_v21  ;;  %s2226_s3 = smov 48  }
 0x3d4   : > { %1140 = vrot.lane.b32.xlu0 %v1139_v23, %s2218_s6  ;;  %s2227_s6 = smov 8  }
 0x3da   : > { %1142 = vrot.lane.b32.xlu2 %v2470_v20, %s2219_s10  ;;  %s2228_s10 = smov 40  }
 0x3dc   : > { %1114 = vrot.lane.b32.xlu0 %v2470_v20, %s2220_s0 }
 0x3e4   : > { %1204 = vrot.lane.b32.xlu0 %v2470_v20, %s2221_s11  ;;  %s2229_s11 = smov 16  }
 0x3ec   : > { %1266 = vrot.lane.b32.xlu0 %v2470_v20, %s2222_s2  ;;  %s2230_s2 = smov 24  }
 0x3f4   : > { %1264 = vrot.lane.b32.xlu0 %v1139_v23, %s2223_s7 }
 0x42c   : > { %v1081_v24 = vpop.permute.xlu2 %1080 }
 0x42d   : > { %v1087_v25 = vsel %vm1082_vm8, %v1081_v24, 0 }
 0x42e   : > { %1096 = vmatpush.bf16.xpose.msra.mxu3 %v1087_v25 }
 0x434   : > { %v1143_v26 = vpop.permute.xlu2 %1142 }
 0x435   : > { %v1148_v27 = vsel %vm1082_vm8, %v1143_v26, 0  ;;  %2000 = vmatmul.msk.bf16.vlgmr.msra.gmra.mxu3 %vm1082_vm8, %v1075_v18 }
 0x436   : > { %1157 = vmatpush.bf16.xpose.msra.mxu2 %v1148_v27 }
 0x446   : > { %v1141_v28 = vpop.permute.xlu0 %1140 }
 0x447   : > { %2002 = vmatmul.msk.bf16.vlgmr.msra.gmra.mxu2 %vm1082_vm8, %v1141_v28 }
 0x44e   : > { %v1115_v29 = vpop.permute.xlu0 %1114 }
 0x44f   : > { %v1121_v30 = vsel %vm1119_vm9, %v1115_v29, 0 }
 0x450   : > { %1130 = vmatpush.bf16.msra.mxu0 %v1121_v30 }
 0x456   : > { %v1205_v31 = vpop.permute.xlu0 %1204 }
 0x457   : > { %v1210_v32 = vsel %vm1082_vm8, %v1205_v31, 0 }
 0x458   : > { %1219 = vmatpush.bf16.xpose.msrb.mxu0 %v1210_v32 }
 0x45e   : > { %v1267_v56 = vpop.permute.xlu0 %1266 }
 0x45f   : > { %v1272_v60 = vsel %vm1082_vm8, %v1267_v56, 0 }
 0x466   : > { %v1265_v62 = vpop.permute.xlu0 %1264 }
 0x4b8   : > { %v1098_v33 = vpop.f32.mrf.mxu3 }
 0x4b9   : > { %v1102_v34 = vsel %vm1082_vm8, %v1098_v33, -inf }
 0x4ba   : > { %1103 = vmax.xlane.f32.xlu1 %v1102_v34 }
 0x4c0   : > { %v1100_v35 = vpop.f32.mrf.mxu3 }
 0x4ca   : > { %v1159_v36 = vpop.f32.mrf.mxu2 }
 0x4cb   : > { %v1163_v37 = vsel %vm1082_vm8, %v1159_v36, -inf }
 0x4cc   : > { %1164 = vmax.xlane.f32.xlu2 %v1163_v37 }
 0x4d2   : > { %v1161_v38 = vpop.f32.mrf.mxu2 }
 0x4e4   : > { %1202 = vrot.lane.b32.xlu2 %v1139_v23, %s2224_s1 }
 0x52d   : > { %v1104_v39 = vpop.xlane.xlu1 %1103 }
 0x52e   : > { %v1105_v40 = vsub.f32 %v1098_v33, %v1104_v39 }
 0x530   : > { %v1106_v41 = vmul.f32 1.442695, %v1105_v40 }
 0x532   : > { %2178 = vpow2.f32 %v1106_v41 }
 0x538   : > { %v2179_v42 = vpop.eup %2178 }
 0x539   : > { %v1108_v43 = vsel %vm1082_vm8, %v2179_v42, 0.0 }
 0x53a   : > { %1109 = vadd.xlane.f32.xlu1 %v1108_v43 }
 0x53f   : > { %v1165_v44 = vpop.xlane.xlu2 %1164 }
 0x540   : > { %v1166_v45 = vsub.f32 %v1159_v36, %v1165_v44 }
 0x542   : > { %v1167_v46 = vmul.f32 1.442695, %v1166_v45 }
 0x544   : > { %2180 = vpow2.f32 %v1167_v46 }
 0x547   : > { %v1203_v53 = vpop.permute.xlu2 %1202 }
 0x54a   : > { %v2181_v47 = vpop.eup %2180 }
 0x54b   : > { %v1169_v48 = vsel %vm1082_vm8, %v2181_v47, 0.0 }
 0x54c   : > { %1170 = vadd.xlane.f32.xlu1 %v1169_v48 }
 0x565   : > { %1175 = vrot.lane.b32.xlu1 %v2470_v20, %s2225_s30  ;;  %s2753_s30 = sld [smem:[#allocation14_spill]] }
 0x56b   : > { %v2099_v39 = vld [vmem:[%s2753_s30 + $0x8] sm:$0xff]  ;;  %v2098_v40 = vld [vmem:[%s2753_s30] sm:$0xff] }
 0x5ad   : > { %v1110_v49 = vpop.xlane.xlu1 %1109 }
 0x5ae   : > { %2182 = vrcp.f32 %v1110_v49 }
 0x5b4   : > { %v2183_v50 = vpop.eup %2182 }
 0x5b5   : > { %v1112_v51 = vmul.f32 %v2183_v50, %v2179_v42 }
 0x5b7   : > { %v1113_v52 = vpack.c.bf16 %v1112_v51, %v1112_v51 }
 0x5b9   : > { %2001 = vmatmul.msk.bf16.vlgmr.msra.gmra.mxu0 %vm1082_vm8, %v1113_v52 }
 0x5ba   : > { %1353 = vmatpush.bf16.msra.mxu0 %v2099_v39  ;;  %v2150_v39 = vld [vmem:[%s2711_s16 + $0x1] ss:$0 sm:$0xff] }
 0x5be   : > { %1354 = vmatpush.bf16.msra.mxu0 %v2098_v40 }
 0x5bf   : > { %v1171_v54 = vpop.xlane.xlu1 %1170 }
 0x5c0   : > { %2184 = vrcp.f32 %v1171_v54 }
 0x5c6   : > { %v2185_v55 = vpop.eup %2184 }
 0x5c7   : > { %v1173_v57 = vmul.f32 %v2185_v55, %v2181_v47  ;;  %v2100_v55 = vld [vmem:[%s2710_s15] sm:$0xff] }
 0x5c9   : > { %2004 = vmatmul.msk.bf16.vlgmr.msrb.gmra.mxu0 %vm1082_vm8, %v1203_v53  ;;  %v1174_v61 = vpack.c.bf16 %v1173_v57, %v1173_v57 }
 0x5d7   : > { %v1176_v58 = vpop.permute.xlu1 %1175 }
 0x5d8   : > { %v1181_v59 = vsel %vm1119_vm9, %v1176_v58, 0 }
 0x5d9   : > { %1190 = vmatpush.bf16.msrb.mxu3 %v1181_v59 }
 0x5dc   : > { %2003 = vmatmul.msk.bf16.vlgmr.msrb.gmra.mxu3 %vm1082_vm8, %v1174_v61 }
 0x5dd   : > { %1281 = vmatpush.bf16.xpose.msra.mxu3 %v1272_v60 }
 0x5ec   : > { %2006 = vmatmul.msk.bf16.vlgmr.msra.gmra.mxu3 %vm1082_vm8, %v1265_v62 }
 0x636   : > { %v1132_v63 = vpop.f32.mrf.mxu0 }
 0x637   : > { %1136 = vst.msk [vmem:[#allocation2] sm:$0xff] %vm1082_vm8, %v1132_v63 }
 0x63e   : > { %v1134_v0 = vpop.f32.mrf.mxu0 }
 0x646   : > { %v1221_v1 = vpop.f32.mrf.mxu0 }
 0x647   : > { %v1225_v2 = vsel %vm1082_vm8, %v1221_v1, -inf }
 0x648   : > { %1226 = vmax.xlane.f32.xlu1 %v1225_v2 }
 0x64e   : > { %v1223_v3 = vpop.f32.mrf.mxu0 }
 0x65f   : > { %v1192_v4 = vpop.f32.mrf.mxu3 }
 0x667   : > { %v1194_v5 = vpop.f32.mrf.mxu3 }
 0x66f   : > { %v1283_v6 = vpop.f32.mrf.mxu3 }
 0x670   : > { %v1287_v7 = vsel %vm1082_vm8, %v1283_v6, -inf }
 0x671   : > { %1288 = vmax.xlane.f32.xlu0 %v1287_v7 }
 0x677   : > { %v1285_v9 = vpop.f32.mrf.mxu3 }
 0x685   : > { %1237 = vrot.lane.b32.xlu0 %v2470_v20, %s2226_s3  ;;  %s2755_s3 = sshll.u32 %s2757_s5, 3 }
 0x6bb   : > { %v1227_v10 = vpop.xlane.xlu1 %1226 }
 0x6bc   : > { %v1228_v12 = vsub.f32 %v1221_v1, %v1227_v10  ;;  %v2147_v1 = vld [vmem:[%s2708_s13] ss:$0 sm:$0xff] }
 0x6be   : > { %v1229_v13 = vmul.f32 1.442695, %v1228_v12 }
 0x6c0   : > { %2186 = vpow2.f32 %v1229_v13 }
 0x6c6   : > { %v2187_v14 = vpop.eup %2186 }
 0x6c7   : > { %v1231_v15 = vsel %vm1082_vm8, %v2187_v14, 0.0 }
 0x6c8   : > { %1232 = vadd.xlane.f32.xlu2 %v1231_v15 }
 0x6e0   : > { %1197 = vrot.lane.b32.xlu2 %v1192_v4, %s2227_s6  ;;  %v2148_v4 = vld [vmem:[%s2709_s14] ss:$0 sm:$0xff] }
 0x6e4   : > { %v1289_v16 = vpop.xlane.xlu0 %1288 }
 0x6e5   : > { %v1290_v17 = vsub.f32 %v1283_v6, %v1289_v16 }
 0x6e7   : > { %v1291_v18 = vmul.f32 1.442695, %v1290_v17 }
 0x6e9   : > { %2188 = vpow2.f32 %v1291_v18 }
 0x6ef   : > { %v2189_v19 = vpop.eup %2188 }
 0x6f0   : > { %v1293_v21 = vsel %vm1082_vm8, %v2189_v19, 0.0 }
 0x6f1   : > { %1294 = vadd.xlane.f32.xlu1 %v1293_v21 }
 0x6f7   : > { %v1238_v22 = vpop.permute.xlu0 %1237 }
 0x6f8   : > { %v1243_v23 = vsel %vm1119_vm9, %v1238_v22, 0 }
 0x6f9   : > { %1252 = vmatpush.bf16.msrb.mxu2 %v1243_v23 }
 0x70a   : > { %1299 = vrot.lane.b32.xlu1 %v2470_v20, %s2228_s10 }
 0x73b   : > { %v1233_v24 = vpop.xlane.xlu2 %1232 }
 0x73c   : > { %2190 = vrcp.f32 %v1233_v24 }
 0x742   : > { %v2191_v25 = vpop.eup %2190 }
 0x743   : > { %v1235_v26 = vmul.f32 %v2191_v25, %v2187_v14  ;;  %v1198_v27 = vpop.permute.xlu2 %1197 }
 0x744   : > { %1201 = vst.msk [vmem:[#allocation2] sm:$0xff] %vm1200_vm10, %v1198_v27  ;;  %v2105_v27 = vld [vmem:[%s2714_s19 + $0x18] sm:$0xff] }
 0x745   : > { %v1236_v28 = vpack.c.bf16 %v1235_v26, %v1235_v26  ;;  %1693 = vmatpush.bf16.msrb.mxu3 %v2105_v27  ;;  %v2159_v27 = vld [vmem:[%s2711_s16 + $0xa] ss:$0 sm:$0xff] }
 0x747   : > { %2005 = vmatmul.msk.bf16.vlgmr.msrb.gmra.mxu2 %vm1082_vm8, %v1236_v28  ;;  %v2104_v28 = vld [vmem:[%s2714_s19 + $0x10] sm:$0xff] }
 0x749   : > { %1694 = vmatpush.bf16.msrb.mxu3 %v2104_v28 }
 0x764   : > { %v1295_v29 = vpop.xlane.xlu1 %1294 }
 0x765   : > { %2192 = vrcp.f32 %v1295_v29  ;;  %v2103_v29 = vld [vmem:[%s2714_s19 + $0x8] sm:$0xff] }
 0x766   : > { %1695 = vmatpush.bf16.msrb.mxu3 %v2103_v29 }
 0x76b   : > { %v2193_v30 = vpop.eup %2192 }
 0x76c   : > { %v1297_v31 = vmul.f32 %v2193_v30, %v2189_v19  ;;  %v2102_v30 = vld [vmem:[%s2714_s19] sm:$0xff] }
 0x76d   : > { %1696 = vmatpush.bf16.msrb.mxu3 %v2102_v30 }
 0x76e   : > { %v1298_v34 = vpack.c.bf16 %v1297_v31, %v1297_v31  ;;  %v1455_v31 = vlaneseq }
 0x77c   : > { %v1300_v32 = vpop.permute.xlu1 %1299 }
 0x77d   : > { %v1305_v33 = vsel %vm1119_vm9, %v1300_v32, 0  ;;  %v2551_v32 = vshrl.u32 %v1455_v31, 7 }
 0x77e   : > { %1314 = vmatpush.bf16.msrb.mxu1 %v1305_v33 }
 0x77f   : > { %v1459_v33 = vadd.s32 4294967289, %v2551_v32  ;;  %v1507_v40 = vadd.s32 4294967293, %v2551_v32  ;;  %v1601_v28 = vadd.s32 6, %v2551_v32 }
 0x781   : > { %2007 = vmatmul.msk.bf16.vlgmr.msrb.gmra.mxu1 %vm1082_vm8, %v1298_v34  ;;  %v1471_v34 = vadd.s32 4294967290, %v2551_v32  ;;  %vm1460_vm5 = vcmp.ge.s32.totalorder %v1459_v33, 0  ;;  %vm1508_vm9 = vcmp.ge.s32.totalorder %v1507_v40, 0  ;;  %v2160_v33 = vld [vmem:[%s2711_s16 + $0xb] ss:$0 sm:$0xff] }
 0x783   : > { %vm1472_vm6 = vcmp.ge.s32.totalorder %v1471_v34, 0  ;;  %v1612_v34 = vadd.s32 7, %v2551_v32 }
 0x7ca   : > { %v1254_v20 = vpop.f32.mrf.mxu2 }
 0x7cb   : > { %1259 = vrot.lane.b32.xlu0 %v1254_v20, %s2229_s11  ;;  %v1483_v20 = vadd.s32 4294967291, %v2551_v32  ;;  %s840_s11 = scalar_lea.vmem %s2723_s28, %s2755_s3 }
 0x7cd   : > { %vm1484_vm7 = vcmp.ge.s32.totalorder %v1483_v20, 0 }
 0x7d2   : > { %v1256_v35 = vpop.f32.mrf.mxu2 }
 0x7fe   : > { %v1316_v36 = vpop.f32.mrf.mxu1 }
 0x7ff   : > { %1321 = vrot.lane.b32.xlu0 %v1316_v36, %s2230_s2  ;;  %s2754_s2 = sld [smem:[#allocation15_spill]]  ;;  %v1495_v36 = vadd.s32 4294967292, %v2551_v32 }
 0x801   : > { %vm1496_vm8 = vcmp.ge.s32.totalorder %v1495_v36, 0 }
 0x805   : > { %v2146_v44 = vld [vmem:[%s2754_s2] ss:$0 sm:$0xff] }
 0x806   : > { %v1318_v37 = vpop.f32.mrf.mxu1 }
 0x807   : > { %v2149_v37 = vld [vmem:[%s2711_s16] ss:$0 sm:$0xff] }
 0x83d   : > { %v1260_v38 = vpop.permute.xlu0 %1259 }
 0x83e   : > { %1263 = vst.msk [vmem:[#allocation2] sm:$0xff] %vm1262_vm11, %v1260_v38 }
 0x871   : > { %v1322_v41 = vpop.permute.xlu0 %1321 }
 0x872   : > { %1325 = vst.msk [vmem:[#allocation2] sm:$0xff] %vm1324_vm12, %v1322_v41 }
 0x879   : > { %v1326_v42 = vld [vmem:[#allocation2] sm:$0xff] }
 0x87a   : > { %v1327_v43 = vpack.c.bf16 %v1326_v42, %v1326_v42 }
 0x87c   : > { %2016 = vmatmul.msk.bf16.vlgmr.msra.gmra.mxu0 %vm845_vm0, %v1327_v43 }
 0x8f9   : > { %v1356_v45 = vpop.f32.mrf.mxu0 }
 0x8fa   : > { %v1360_v46 = vadd.f32 %v1356_v45, %v2462_v11  ;;  %v2101_v11 = vld [vmem:[%s2710_s15 + $0x8] sm:$0xff]  ;;  %v2151_v45 = vld [vmem:[%s2711_s16 + $0x2] ss:$0 sm:$0xff] }
 0x8fb   : > { %1424 = vmatpush.bf16.msra.mxu2 %v2101_v11  ;;  %v1531_v11 = vadd.s32 4294967295, %v2551_v32 }
 0x8fc   : > { %v2517_v47 = vadd.f32 %v2146_v44, %v1360_v46  ;;  %v1519_v46 = vadd.s32 4294967294, %v2551_v32 }
 0x8fd   : > { %vm1532_vm11 = vcmp.ge.s32.totalorder %v1531_v11, 0 }
 0x8fe   : > { %v1368_v48 = vsel %vm845_vm0, %v2517_v47, 0.0  ;;  %vm1520_vm10 = vcmp.ge.s32.totalorder %v1519_v46, 0 }
 0x8ff   : > { %1369 = vadd.xlane.f32.xlu1 %v1368_v48  ;;  %1425 = vmatpush.bf16.msra.mxu2 %v2100_v55 }
 0x901   : > { %v1358_v49 = vpop.f32.mrf.mxu0 }
 0x972   : > { %v1370_v50 = vpop.xlane.xlu1 %1369 }
 0x973   : > { %v1371_v51 = vmul.f32 %v1370_v50, %v2396_v8 }
 0x975   : > { %v1372_v52 = vsub.f32 %v2517_v47, %v1371_v51 }
 0x977   : > { %v1373_v53 = vmul.f32 %v1372_v52, %v1372_v52 }
 0x979   : > { %v1374_v54 = vsel %vm845_vm0, %v1373_v53, 0.0 }
 0x97a   : > { %1375 = vadd.xlane.f32.xlu0 %v1374_v54  ;;  %v2152_v54 = vld [vmem:[%s2711_s16 + $0x3] ss:$0 sm:$0xff] }
 0x9ed   : > { %v1376_v56 = vpop.xlane.xlu0 %1375 }
 0x9ee   : > { %v1377_v57 = vmul.f32 %v1376_v56, %v2396_v8 }
 0x9f0   : > { %v1378_v58 = vadd.f32 1e-05, %v1377_v57 }
 0x9f2   : > { %2194 = vrsqrt.f32 %v1378_v58  ;;  %vm1385_vm14 = vweird.f32 %v1378_v58 }
 0x9f8   : > { %v2195_v59 = vpop.eup %2194 }
 0x9f9   : > { %v1380_v60 = vmul.f32 %v2195_v59, %v1378_v58  ;;  %vm1386_vm13 = vweird.f32 %v2195_v59 }
 0x9fa   : > { %vm1387_vm15 = vmor %vm1385_vm14, %vm1386_vm13 }
 0x9fb   : > { %v1381_v61 = vmul.f32 %v2195_v59, %v1380_v60 }
 0x9fd   : > { %v1382_v62 = vmul.f32 0.5, %v1381_v61 }
 0x9ff   : > { %v1383_v63 = vsub.f32 1.5, %v1382_v62 }
 0xa01   : > { %v1384_v0 = vmul.f32 %v2195_v59, %v1383_v63 }
 0xa03   : > { %v1388_v2 = vsel %vm1387_vm15, %v2195_v59, %v1384_v0  ;;  %v2153_v59 = vld [vmem:[%s2711_s16 + $0x4] ss:$0 sm:$0xff]  ;;  %v2154_v0 = vld [vmem:[%s2711_s16 + $0x5] ss:$0 sm:$0xff] }
 0xa04   : > { %v1389_v3 = vmul.f32 %v1388_v2, %v1372_v52 }
 0xa06   : > { %v1393_v5 = vmul.f32 %v2147_v1, %v1389_v3  ;;  %v1546_v1 = vadd.s32 1, %v2551_v32 }
 0xa08   : > { %v1397_v6 = vadd.f32 %v2148_v4, %v1393_v5  ;;  %v2155_v5 = vld [vmem:[%s2711_s16 + $0x6] ss:$0 sm:$0xff]  ;;  %vm1548_vm12 = vcmp.lt.s32.totalorder %v1546_v1, 8 }
 0xa0a   : > { %v1398_v7 = vpack.c.bf16 %v1397_v6, %v1397_v6  ;;  %v1557_v6 = vadd.s32 2, %v2551_v32 }
 0xa0c   : > { %2025 = vmatmul.msk.bf16.vlgmr.msra.gmra.mxu2 %vm845_vm0, %v1398_v7  ;;  %vm1559_vm13 = vcmp.lt.s32.totalorder %v1557_v6, 8 }
 0xa8f   : > { %v1427_v9 = vpop.f32.mrf.mxu2 }
 0xa90   : > { %v1431_v10 = vsub.f32 0.0, %v1427_v9 }
 0xa92   : > { %v1432_v12 = vmul.f32 1.442695, %v1431_v10 }
 0xa94   : > { %2196 = vpow2.f32 %v1432_v12  ;;  %v2156_v12 = vld [vmem:[%s2711_s16 + $0x7] ss:$0 sm:$0xff] }
 0xa97   : > { %v1429_v13 = vpop.f32.mrf.mxu2 }
 0xa98   : > { %v1568_v13 = vadd.s32 3, %v2551_v32 }
 0xa9a   : > { %v2197_v14 = vpop.eup %2196  ;;  %vm1570_vm14 = vcmp.lt.s32.totalorder %v1568_v13, 8 }
 0xa9b   : > { %v1434_v15 = vadd.f32 1.0, %v2197_v14 }
 0xa9d   : > { %2198 = vrcp.f32 %v1434_v15  ;;  %v1446_v19 = vand.u32 2147483648, %v1434_v15  ;;  %v1444_v22 = vand.u32 2147483647, %v1434_v15  ;;  %vm1440_vm2 = vweird.f32 %v1434_v15 }
 0xa9f   : > { %v1447_v24 = vor.u32 1.1754944e-38, %v1446_v19  ;;  %vm1445_vm4 = vcmp.eq.f32.partialorder %v1444_v22, 8.507059e+37  ;;  %v2158_v22 = vld [vmem:[%s2711_s16 + $0x9] ss:$0 sm:$0xff] }
 0xaa3   : > { %v2199_v16 = vpop.eup %2198 }
 0xaa4   : > { %v1436_v17 = vmul.f32 %v2199_v16, %v1434_v15  ;;  %vm1441_vm1 = vweird.f32 %v2199_v16 }
 0xaa5   : > { %vm1442_vm3 = vmor %vm1440_vm2, %vm1441_vm1  ;;  %vm1603_vm2 = vcmp.lt.s32.totalorder %v1601_v28, 8 }
 0xaa6   : > { %v1437_v18 = vsub.f32 1.0, %v1436_v17  ;;  %v1579_v17 = vadd.s32 4, %v2551_v32 }
 0xaa8   : > { %v1438_v21 = vmul.f32 %v2199_v16, %v1437_v18  ;;  %vm1581_vm15 = vcmp.lt.s32.totalorder %v1579_v17, 8 }
 0xaaa   : > { %v1439_v23 = vadd.f32 %v2199_v16, %v1438_v21 }
 0xaac   : > { %v1443_v25 = vsel %vm1442_vm3, %v2199_v16, %v1439_v23  ;;  %v2157_v16 = vld [vmem:[%s2711_s16 + $0x8] ss:$0 sm:$0xff]  ;;  %v1590_v23 = vadd.s32 5, %v2551_v32  ;;  %vm1614_vm3 = vcmp.lt.s32.totalorder %v1612_v34, 8  ;;  %v2163_v32 = vld [vmem:[%s2711_s16 + $0xe] ss:$0 sm:$0xff] }
 0xaad   : > { %v1448_v26 = vsel %vm1445_vm4, %v1447_v24, %v1443_v25 }
 0xaae   : > { %1451 = vrot.lane.b32.xlu2 %v1448_v26, %s2220_s0  ;;  %vm1592_vm1 = vcmp.lt.s32.totalorder %v1590_v23, 8  ;;  %v2114_v23 = vld [vmem:[%s2719_s24 + $0x30] sm:$0xff] }
 0xb08   : > { %v1452_v35 = vpop.permute.xlu2 %1451 }
 0xb09   : > { %v2560_v38 = vmul.f32 %v1452_v35, %v1427_v9 }
 0xb0b   : > { %v1458_v41 = vrot.slane %v2560_v38, 1  ;;  %v1470_v42 = vrot.slane %v2560_v38, 2  ;;  %v1482_v43 = vrot.slane %v2560_v38, 3  ;;  %v1494_v44 = vrot.slane %v2560_v38, 4 }
 0xb0c   : > { %v1506_v51 = vrot.slane %v2560_v38, 5  ;;  %v1518_v56 = vrot.slane %v2560_v38, 6  ;;  %v1530_v61 = vrot.slane %v2560_v38, 7  ;;  %v1543_v21 = vmul.f32 %v2156_v12, %v2560_v38 }
 0xb0d   : > { %v1465_v48 = vsel %vm1460_vm5, %v1458_v41, 0.0  ;;  %v1477_v49 = vsel %vm1472_vm6, %v1470_v42, 0.0  ;;  %v1489_v50 = vsel %vm1484_vm7, %v1482_v43, 0.0  ;;  %v1501_v55 = vsel %vm1496_vm8, %v1494_v44, 0.0 }
 0xb0e   : > { %v1467_v52 = vmul.f32 %v2149_v37, %v1465_v48  ;;  %v1479_v53 = vmul.f32 %v2150_v39, %v1477_v49  ;;  %v1491_v58 = vmul.f32 %v2151_v45, %v1489_v50  ;;  %v1513_v60 = vsel %vm1508_vm9, %v1506_v51, 0.0  ;;  %v2161_v37 = vld [vmem:[%s2711_s16 + $0xc] ss:$0 sm:$0xff] }
 0xb0f   : > { %v1503_v63 = vmul.f32 %v2152_v54, %v1501_v55  ;;  %v1525_v2 = vsel %vm1520_vm10, %v1518_v56, 0.0  ;;  %v1515_v4 = vmul.f32 %v2153_v59, %v1513_v60  ;;  %v1537_v7 = vsel %vm1532_vm11, %v1530_v61, 0.0 }
 0xb10   : > { %v1480_v57 = vadd.f32 %v1479_v53, %v1467_v52  ;;  %v1527_v10 = vmul.f32 %v2154_v0, %v1525_v2  ;;  %v1539_v15 = vmul.f32 %v2155_v5, %v1537_v7  ;;  %v1552_v18 = vsel %vm1548_vm12, %v1458_v41, 0.0  ;;  %v2162_v41 = vld [vmem:[%s2711_s16 + $0xd] ss:$0 sm:$0xff]  ;;  %v2165_v53 = vld [vmem:[%s2713_s18] ss:$0 sm:$0xff] }
 0xb11   : > { %v1563_v24 = vsel %vm1559_vm13, %v1470_v42, 0.0  ;;  %v1554_v26 = vmul.f32 %v2157_v16, %v1552_v18  ;;  %v1574_v29 = vsel %vm1570_vm14, %v1482_v43, 0.0  ;;  %v1585_v20 = vsel %vm1581_vm15, %v1494_v44, 0.0  ;;  %v2107_v18 = vld [vmem:[%s2717_s22 + $0x8] sm:$0xff] }
 0xb12   : > { %v1492_v62 = vadd.f32 %v1491_v58, %v1480_v57  ;;  %v1565_v31 = vmul.f32 %v2158_v22, %v1563_v24  ;;  %v1576_v36 = vmul.f32 %v2159_v27, %v1574_v29  ;;  %v1596_v38 = vsel %vm1592_vm1, %v1506_v51, 0.0  ;;  %v2164_v51 = vld [vmem:[%s2712_s17] ss:$0 sm:$0xff]  ;;  %1765 = vmatpush.bf16.msra.mxu1 %v2107_v18  ;;  %v2111_v29 = vld [vmem:[%s2719_s24 + $0x18] sm:$0xff] }
 0xb13   : > { %v1587_v40 = vmul.f32 %v2160_v33, %v1585_v20  ;;  %v1607_v42 = vsel %vm1603_vm2, %v1518_v56, 0.0  ;;  %v1598_v45 = vmul.f32 %v2161_v37, %v1596_v38  ;;  %v1618_v44 = vsel %vm1614_vm3, %v1530_v61, 0.0  ;;  %v2110_v33 = vld [vmem:[%s2719_s24 + $0x10] sm:$0xff]  ;;  %v2167_v38 = vld [vmem:[%s2716_s21] ss:$0 sm:$0xff] }
 0xb14   : > { %v1504_v3 = vadd.f32 %v1503_v63, %v1492_v62  ;;  %v1609_v48 = vmul.f32 %v2162_v41, %v1607_v42  ;;  %v1620_v50 = vmul.f32 %v2163_v32, %v1618_v44  ;;  %vm1685_vm8 = vcmask 523264   ;;  %v2109_v42 = vld [vmem:[%s2719_s24 + $0x8] sm:$0xff] }
 0xb16   : > { %v1516_v9 = vadd.f32 %v1515_v4, %v1504_v3 }
 0xb18   : > { %v1528_v14 = vadd.f32 %v1527_v10, %v1516_v9 }
 0xb1a   : > { %v1540_v19 = vadd.f32 %v1539_v15, %v1528_v14 }
 0xb1c   : > { %v1544_v25 = vadd.f32 %v1543_v21, %v1540_v19  ;;  %v2115_v19 = vld [vmem:[%s2719_s24 + $0x38] sm:$0xff] }
 0xb1d   : > { %1842 = vmatpush.bf16.msrb.mxu0 %v2115_v19 }
 0xb1e   : > { %v1555_v30 = vadd.f32 %v1554_v26, %v1544_v25  ;;  %v2113_v25 = vld [vmem:[%s2719_s24 + $0x28] sm:$0xff]  ;;  %v2112_v26 = vld [vmem:[%s2719_s24 + $0x20] sm:$0xff] }
 0xb20   : > { %v1566_v35 = vadd.f32 %v1565_v31, %v1555_v30 }
 0xb21   : > { %1843 = vmatpush.bf16.msrb.mxu0 %v2114_v23 }
 0xb22   : > { %v1577_v39 = vadd.f32 %v1576_v36, %v1566_v35  ;;  %v2166_v35 = vld [vmem:[%s2715_s20] ss:$0 sm:$0xff] }
 0xb24   : > { %v1588_v43 = vadd.f32 %v1587_v40, %v1577_v39 }
 0xb25   : > { %1844 = vmatpush.bf16.msrb.mxu0 %v2113_v25 }
 0xb26   : > { %v1599_v46 = vadd.f32 %v1598_v45, %v1588_v43  ;;  %v2108_v43 = vld [vmem:[%s2719_s24] sm:$0xff] }
 0xb27   : > { %v2168_v45 = vld [vmem:[%s2718_s23] ss:$0 sm:$0xff] }
 0xb28   : > { %v1610_v49 = vadd.f32 %v1609_v48, %v1599_v46 }
 0xb29   : > { %1845 = vmatpush.bf16.msrb.mxu0 %v2112_v26 }
 0xb2a   : > { %v1621_v52 = vadd.f32 %v1620_v50, %v1610_v49  ;;  %v2169_v50 = vld [vmem:[%s2720_s25] ss:$0 sm:$0xff] }
 0xb2c   : > { %v1626_v54 = vmul.f32 %v2164_v51, %v1621_v52 }
 0xb2d   : > { %1846 = vmatpush.bf16.msrb.mxu0 %v2111_v29 }
 0xb2e   : > { %v1631_v11 = vadd.f32 %v2165_v53, %v1626_v54 }
 0xb30   : > { %v1632_v55 = vsub.f32 0.0, %v1631_v11 }
 0xb31   : > { %1847 = vmatpush.bf16.msrb.mxu0 %v2110_v33 }
 0xb32   : > { %v1633_v56 = vmul.f32 1.442695, %v1632_v55 }
 0xb34   : > { %2200 = vpow2.f32 %v1633_v56 }
 0xb35   : > { %1848 = vmatpush.bf16.msrb.mxu0 %v2109_v42 }
 0xb39   : > { %1849 = vmatpush.bf16.msrb.mxu0 %v2108_v43 }
 0xb3a   : > { %v2201_v57 = vpop.eup %2200 }
 0xb3b   : > { %v1635_v58 = vadd.f32 1.0, %v2201_v57 }
 0xb3d   : > { %2202 = vrcp.f32 %v1635_v58  ;;  %v1647_v62 = vand.u32 2147483648, %v1635_v58  ;;  %v1645_v0 = vand.u32 2147483647, %v1635_v58  ;;  %vm1641_vm5 = vweird.f32 %v1635_v58 }
 0xb3f   : > { %v1648_v2 = vor.u32 1.1754944e-38, %v1647_v62  ;;  %vm1646_vm7 = vcmp.eq.f32.partialorder %v1645_v0, 8.507059e+37 }
 0xb43   : > { %v2203_v59 = vpop.eup %2202 }
 0xb44   : > { %v1637_v60 = vmul.f32 %v2203_v59, %v1635_v58  ;;  %vm1642_vm4 = vweird.f32 %v2203_v59 }
 0xb45   : > { %vm1643_vm6 = vmor %vm1641_vm5, %vm1642_vm4 }
 0xb46   : > { %v1638_v61 = vsub.f32 1.0, %v1637_v60 }
 0xb48   : > { %v1639_v63 = vmul.f32 %v2203_v59, %v1638_v61 }
 0xb4a   : > { %v1640_v1 = vadd.f32 %v2203_v59, %v1639_v63 }
 0xb4c   : > { %v1644_v3 = vsel %vm1643_vm6, %v2203_v59, %v1640_v1 }
 0xb4d   : > { %v1649_v4 = vsel %vm1646_vm7, %v1648_v2, %v1644_v3 }
 0xb4e   : > { %v1651_v5 = vmul.f32 %v1649_v4, %v1631_v11 }
 0xb50   : > { %v1652_v6 = vpack.c.bf16 %v1651_v5, %v1651_v5 }
 0xb52   : > { %2042 = vmatmul.msk.bf16.vlgmr.msrb.gmra.mxu3 %vm1685_vm8, %v1652_v6  ;;  %v2170_v6 = vld [vmem:[%s2721_s26] ss:$0 sm:$0xff] }
 0xbd5   : > { %v1698_v7 = vpop.f32.mrf.mxu3 }
 0xbd6   : > { %v1702_v9 = vadd.f32 %v1698_v7, %v2517_v47  ;;  %v2106_v47 = vld [vmem:[%s2717_s22] sm:$0xff] }
 0xbd7   : > { %1766 = vmatpush.bf16.msra.mxu1 %v2106_v47 }
 0xbd8   : > { %v1705_v10 = vsel %vm845_vm0, %v1702_v9, 0.0 }
 0xbd9   : > { %1706 = vadd.xlane.f32.xlu2 %v1705_v10 }
 0xbdd   : > { %v1700_v12 = vpop.f32.mrf.mxu3 }
 0xc4c   : > { %v1707_v13 = vpop.xlane.xlu2 %1706 }
 0xc4d   : > { %v1708_v14 = vmul.f32 %v1707_v13, %v2396_v8 }
 0xc4f   : > { %v1709_v15 = vsub.f32 %v1702_v9, %v1708_v14 }
 0xc51   : > { %v1710_v16 = vmul.f32 %v1709_v15, %v1709_v15 }
 0xc53   : > { %v1711_v17 = vsel %vm845_vm0, %v1710_v16, 0.0 }
 0xc54   : > { %1712 = vadd.xlane.f32.xlu1 %v1711_v17 }
 0xcc7   : > { %v1713_v21 = vpop.xlane.xlu1 %1712 }
 0xcc8   : > { %v1714_v22 = vmul.f32 %v1713_v21, %v2396_v8 }
 0xcca   : > { %v1715_v24 = vadd.f32 1e-05, %v1714_v22 }
 0xccc   : > { %2204 = vrsqrt.f32 %v1715_v24  ;;  %vm1722_vm10 = vweird.f32 %v1715_v24 }
 0xcd2   : > { %v2205_v27 = vpop.eup %2204 }
 0xcd3   : > { %v1717_v28 = vmul.f32 %v2205_v27, %v1715_v24  ;;  %vm1723_vm9 = vweird.f32 %v2205_v27 }
 0xcd4   : > { %vm1724_vm11 = vmor %vm1722_vm10, %vm1723_vm9 }
 0xcd5   : > { %v1718_v30 = vmul.f32 %v2205_v27, %v1717_v28 }
 0xcd7   : > { %v1719_v31 = vmul.f32 0.5, %v1718_v30 }
 0xcd9   : > { %v1720_v34 = vsub.f32 1.5, %v1719_v31 }
 0xcdb   : > { %v1721_v20 = vmul.f32 %v2205_v27, %v1720_v34 }
 0xcdd   : > { %v1725_v36 = vsel %vm1724_vm11, %v2205_v27, %v1721_v20 }
 0xcde   : > { %v1726_v37 = vmul.f32 %v1725_v36, %v1709_v15 }
 0xce0   : > { %v1730_v39 = vmul.f32 %v2166_v35, %v1726_v37 }
 0xce2   : > { %v1734_v40 = vadd.f32 %v2167_v38, %v1730_v39 }
 0xce4   : > { %v1735_v41 = vpack.c.bf16 %v1734_v40, %v1734_v40 }
 0xce6   : > { %2051 = vmatmul.msk.bf16.vlgmr.msra.gmra.mxu1 %vm845_vm0, %v1735_v41 }
 0xd63   : > { %v1768_v32 = vpop.f32.mrf.mxu1 }
 0xd64   : > { %v1769_v44 = vadd.f32 %v2168_v45, %v1768_v32 }
 0xd66   : > { %v1772_v46 = vmax.f32 %v1769_v44, 0.0 }
 0xd68   : > { %v1773_v48 = vpack.c.bf16 %v1772_v46, %v1772_v46 }
 0xd6a   : > { %1850 = vmatmul.bf16.vlgmr.msrb.gmra.mxu0 %v1773_v48 }
 0xd6b   : > { %v1770_v49 = vpop.f32.mrf.mxu1 }
 0xde7   : > { %v1851_v51 = vpop.f32.mrf.mxu0 }
 0xde8   : > { %v1852_v52 = vadd.f32 %v2169_v50, %v1851_v51 }
 0xdea   : > { %v1855_v53 = vmul.f32 0.5, %v1852_v52 }
 0xdec   : > { %v1856_v54 = vadd.f32 %v1855_v53, %v1702_v9 }
 0xdee   : > { %v1859_v11 = vsel %vm845_vm0, %v1856_v54, 0.0 }
 0xdef   : > { %v1853_v55 = vpop.f32.mrf.mxu0  ;;  %1860 = vadd.xlane.f32.xlu0 %v1859_v11 }
 0xe62   : > { %v1861_v56 = vpop.xlane.xlu0 %1860 }
 0xe63   : > { %v1862_v57 = vmul.f32 %v1861_v56, %v2396_v8 }
 0xe65   : > { %v1863_v58 = vsub.f32 %v1856_v54, %v1862_v57 }
 0xe67   : > { %v1864_v59 = vmul.f32 %v1863_v58, %v1863_v58 }
 0xe69   : > { %v1865_v60 = vsel %vm845_vm0, %v1864_v59, 0.0 }
 0xe6a   : > { %1866 = vadd.xlane.f32.xlu1 %v1865_v60 }
 0xedd   : > { %v1867_v61 = vpop.xlane.xlu1 %1866 }
 0xede   : > { %v1868_v62 = vmul.f32 %v1867_v61, %v2396_v8  ;;  %v2171_v8 = vld [vmem:[%s2722_s27] ss:$0 sm:$0xff] }
 0xee0   : > { %v1869_v63 = vadd.f32 1e-05, %v1868_v62 }
 0xee2   : > { %2206 = vrsqrt.f32 %v1869_v63  ;;  %vm1876_vm13 = vweird.f32 %v1869_v63 }
 0xee8   : > { %v2207_v0 = vpop.eup %2206 }
 0xee9   : > { %v1871_v1 = vmul.f32 %v2207_v0, %v1869_v63  ;;  %vm1877_vm12 = vweird.f32 %v2207_v0 }
 0xeea   : > { %vm1878_vm14 = vmor %vm1876_vm13, %vm1877_vm12 }
 0xeeb   : > { %v1872_v2 = vmul.f32 %v2207_v0, %v1871_v1 }
 0xeed   : > { %v1873_v3 = vmul.f32 0.5, %v1872_v2 }
 0xeef   : > { %v1874_v4 = vsub.f32 1.5, %v1873_v3 }
 0xef1   : > { %v1875_v5 = vmul.f32 %v2207_v0, %v1874_v4 }
 0xef3   : > { %v1879_v7 = vsel %vm1878_vm14, %v2207_v0, %v1875_v5 }
 0xef4   : > { %v1880_v9 = vmul.f32 %v1879_v7, %v1863_v58 }
 0xef6   : > { %v1884_v10 = vmul.f32 %v2170_v6, %v1880_v9 }
 0xef8   : > { %v1888_v12 = vadd.f32 %v2171_v8, %v1884_v10 }
 0xefa   : > { %1889 = vst.msk [vmem:[%s840_s11] sm:$0xff] %vm845_vm0, %v1888_v12 }
 0xefb PF: > { %s38_s8 = sadd.s32 1, %s2214_s8  }
 0xefc   : > { %p35_p4 = scmp.ge.s32.totalorder %s38_s8, 4  }
 0xefe   :  { %37 = sbr.rel (!%p35_p4) target bundleno = 14 (0xe), region = 162 }

</bundles_post_ra>
